<compile_context>
chip_gen: v7x
topology: tpu7x:2x2x1
jax: 0.10.0
libtpu: 0.0.40
codegen_flags: <defaults>
</compile_context>

<pallas_src>
import functools
import math

import jax
import jax.numpy as jnp
from jax import lax
from jax.experimental import pallas as pl
from jax.experimental.pallas import tpu as pltpu

_HALO = 8  # halo rows fetched from the previous row block (covers pad <= 8)


def _round_up(x, m):
    return ((x + m - 1) // m) * m


def _pixel_effect_kernel(x_ref, h_ref, ph_ref, pwt_ref, eh_ref, ewt_ref,
                         out_ref, *, num_bins, pad, H, halo_on):
    # x_ref:   [3, tH, W]   raw image rows of this tile (partial block at the
    #                       bottom may contain garbage -> masked below)
    # h_ref:   [3, 8, W]    8 halo rows just above this tile's rows
    # ph_ref:  [tHo, tH]    row-window selection (same for every tile)
    # pwt_ref: [W, Wo]      column-window selection (implicit zero pad)
    # eh_ref:  [tHf, tHo]   row nearest-neighbour upsample
    # ewt_ref: [Wo, Wf]     column nearest-neighbour upsample
    # out_ref: [3, tHf, Wf] per-channel lane-dense output block
    f32 = jnp.float32
    i = pl.program_id(0)
    tH, W = x_ref.shape[1], x_ref.shape[2]
    tHo = ph_ref.shape[0]

    r = x_ref[0]
    g = x_ref[1]
    b = x_ref[2]

    # Valid rows of the main block: handles the bottom conv zero-padding and
    # the garbage rows of a partial last block.  Invalid rows contribute
    # nothing to counts or sums (matches the reference conv's zero padding).
    row = i * tH + lax.broadcasted_iota(jnp.int32, (tH, W), 0)
    valid = row < H

    mean = (r + g + b) / 3.0                       # same op order as reference
    idx = jnp.floor(mean / 256.0 * num_bins).astype(jnp.int32)

    if halo_on:
        # Only the first local output row reaches above the block start; it
        # needs the last `pad` halo rows.  Tile 0's halo is the conv zero-pad
        # region -> gated off with (i > 0).
        rh = h_ref[0, _HALO - pad:_HALO, :]
        gh = h_ref[1, _HALO - pad:_HALO, :]
        bh = h_ref[2, _HALO - pad:_HALO, :]
        meanh = (rh + gh + bh) / 3.0
        idxh = jnp.floor(meanh / 256.0 * num_bins).astype(jnp.int32)
        use_halo = i > 0
        row0 = (lax.broadcasted_iota(jnp.int32, (tHo, 1), 0) == 0).astype(f32)

    ph = ph_ref[...]
    pieces = []                                    # 4*nb arrays of [tHo, W]
    for z in range(num_bins):                      # nb is small -> unrolled
        mb = (idx == z) & valid
        m = mb.astype(f32)
        rm = jnp.where(mb, r, 0.0)                 # selects, never mul by NaN
        gm = jnp.where(mb, g, 0.0)
        bm = jnp.where(mb, b, 0.0)
        t_m = jnp.dot(ph, m, preferred_element_type=f32)
        t_r = jnp.dot(ph, rm, preferred_element_type=f32)
        t_g = jnp.dot(ph, gm, preferred_element_type=f32)
        t_b = jnp.dot(ph, bm, preferred_element_type=f32)
        if halo_on:
            mhb = (idxh == z) & use_halo
            t_m = t_m + row0 * jnp.sum(mhb.astype(f32), axis=0, keepdims=True)
            t_r = t_r + row0 * jnp.sum(jnp.where(mhb, rh, 0.0),
                                       axis=0, keepdims=True)
            t_g = t_g + row0 * jnp.sum(jnp.where(mhb, gh, 0.0),
                                       axis=0, keepdims=True)
            t_b = t_b + row0 * jnp.sum(jnp.where(mhb, bh, 0.0),
                                       axis=0, keepdims=True)
        pieces.extend([t_m, t_r, t_g, t_b])

    # One unpadded column-selection matmul for every (bin, channel) at once:
    # restack the 4*nb row-sum planes along sublanes -> M = 4*nb*tHo.
    t_all = jnp.concatenate(pieces, axis=0)                          # [4nb*tHo, W]
    u_all = jnp.dot(t_all, pwt_ref[...], preferred_element_type=f32)  # [., Wo]

    def piece(z, k):
        off = (4 * z + k) * tHo
        return u_all[off:off + tHo, :]

    best_cnt = piece(0, 0)
    best_r, best_g, best_b = piece(0, 1), piece(0, 2), piece(0, 3)
    for z in range(1, num_bins):
        cnt = piece(z, 0)
        better = cnt > best_cnt                    # strict > keeps first argmax
        best_r = jnp.where(better, piece(z, 1), best_r)
        best_g = jnp.where(better, piece(z, 2), best_g)
        best_b = jnp.where(better, piece(z, 3), best_b)
        best_cnt = jnp.where(better, cnt, best_cnt)

    # Exact reciprocal, reused for all three channels.  best_cnt >= 1 for
    # every real output row (every window overlaps the image); the guard only
    # protects padded tail rows of the last tile.
    inv = jnp.where(best_cnt > 0.0, 1.0 / best_cnt, 0.0)             # [tHo, Wo]

    # Nearest-neighbour upsample: column upsample FIRST (on the tiny small
    # image), row upsample last, per channel.
    # TODO(synk): replace the eh matmul with stride-0 sublane-broadcast stores
    # if the MXU ever becomes the binding unit after the other fixes.
    eh = eh_ref[...]
    ewt = ewt_ref[...]
    for c, best in enumerate((best_r, best_g, best_b)):
        small = best * inv                                            # [tHo, Wo]
        up = jnp.dot(small, ewt, preferred_element_type=f32)          # [tHo, Wf]
        out_ref[c] = jnp.dot(eh, up, preferred_element_type=f32)      # [tHf, Wf]


def pixel_effect(rgb, *, param_num_bins=4, param_kernel_size=3,
                 param_pixel_size=32, row_block=None):
    """rgb: [1, 3, H, W] -> [1, 3, Ho*S, Wo*S] float32 (nearest upsample)."""
    bsz, c, H, W = rgb.shape
    assert bsz == 1 and c == 3
    nb, K, S = param_num_bins, param_kernel_size, param_pixel_size
    pad = (K - 1) // 2
    Ho = (H + 2 * pad - K) // S + 1
    Wo = (W + 2 * pad - K) // S + 1
    Hf, Wf = Ho * S, Wo * S
    f32 = jnp.float32

    # ---- chip-aware VMEM budget --------------------------------------------
    try:
        phys_vmem = int(pltpu.get_tpu_info().vmem_capacity_bytes)
    except Exception:
        phys_vmem = 64 * 2 ** 20                  # v7x-safe fallback
    budget = max(24 * 2 ** 20, phys_vmem - 24 * 2 ** 20)

    def vmem_bytes(tHo_, tH_):
        tHf_ = tHo_ * S
        io = 2 * (3 * tH_ * W + 3 * _HALO * W + 3 * tHf_ * Wf)        # dbl-buf
        consts = 2 * (tHo_ * tH_ + W * Wo + Wo * Wf + tHf_ * tHo_)
        tmp = (5 * tH_ * W                          # idx + per-bin mask/products
               + 2 * 4 * nb * tHo_ * W              # t pieces + sublane restack
               + 2 * tHf_ * Wf + tHo_ * Wf)         # upsample temporaries
        return 4 * (io + consts + tmp)

    # ---- row tiling ----------------------------------------------------------
    # A multi-tile split needs each window (minus the halo) to stay inside its
    # own input block (K - pad <= S), pad <= HALO, and tH = tHo*S % 8 == 0.
    multi_ok = (K - pad <= S) and (pad <= _HALO)
    align = 8 // math.gcd(S, 8)
    if row_block is not None:
        tHo = max(1, min(Ho, int(row_block)))
        if tHo < Ho and (not multi_ok or tHo % align != 0):
            tHo = Ho
    elif not multi_ok:
        tHo = Ho
    else:
        # tH = tHo*S ~ 256-deep MXU contraction, tHo >= 8 when it fits; keep
        # >= 2 row tiles whenever Ho allows (megacore on v7x, harmless on
        # single-TC v5e/v6e); shrink until it fits the chip's VMEM budget.
        tHo = _round_up(max(8, -(-256 // S)), align)
        if Ho >= 2 * align:
            tHo = min(tHo, max(align, (Ho // 2 // align) * align))
        tHo = min(tHo, _round_up(Ho, align))
        while tHo > align and vmem_bytes(tHo, tHo * S) > budget:
            tHo -= align
        tHo = max(align, tHo)

    Gh = -(-Ho // tHo)
    if Gh == 1:
        tHo = Ho
        # rows actually touched by any window (bottom zero-pad excluded)
        tH = _round_up(max(8, min((tHo - 1) * S + (K - pad), H)), 8)
    else:
        tH = tHo * S
    tHf = tHo * S
    halo_on = (Gh > 1) and (pad > 0)

    # ---- selection / upsample matrices (constants, same for every tile) -----
    def win_sel(n_out, n_in):                       # [n_out, n_in] row windows
        o = jnp.arange(n_out)[:, None]
        j = jnp.arange(n_in)[None, :]
        d = j - (o * S - pad)
        return ((d >= 0) & (d < K)).astype(f32)

    def up_mat(n_out, n_in):                        # nearest-neighbour repeat
        o = jnp.arange(n_out)[:, None]
        j = jnp.arange(n_in)[None, :]
        return (o // S == j).astype(f32)

    ph = win_sel(tHo, tH)                           # [tHo, tH]
    pwt = win_sel(Wo, W).T                          # [W, Wo]   (unpadded)
    eh = up_mat(tHf, tHo)                           # [tHf, tHo]
    ewt = up_mat(Wf, Wo).T                          # [Wo, Wf]

    est = vmem_bytes(tHo, tH)
    vmem_limit = int(min(max(phys_vmem - 2 * 2 ** 20, 32 * 2 ** 20),
                         max(32 * 2 ** 20, int(est * 1.3))))

    x = rgb[0].astype(f32)                          # [3, H, W], no pad copy

    kernel = functools.partial(_pixel_effect_kernel, num_bins=nb, pad=pad,
                               H=H, halo_on=halo_on)
    out = pl.pallas_call(
        kernel,
        out_shape=jax.ShapeDtypeStruct((3, Gh * tHf, Wf), f32),
        grid=(Gh,),
        in_specs=[
            pl.BlockSpec((3, tH, W), lambda i: (0, i, 0)),            # main rows
            pl.BlockSpec((3, _HALO, W),                                # halo rows
                         lambda i: (0, jnp.maximum(i * (tH // 8) - 1, 0), 0)),
            pl.BlockSpec((tHo, tH), lambda i: (0, 0)),
            pl.BlockSpec((W, Wo), lambda i: (0, 0)),
            pl.BlockSpec((tHf, tHo), lambda i: (0, 0)),
            pl.BlockSpec((Wo, Wf), lambda i: (0, 0)),
        ],
        out_specs=pl.BlockSpec((3, tHf, Wf), lambda i: (0, i, 0)),
        compiler_params=pltpu.CompilerParams(
            dimension_semantics=("parallel",),
            vmem_limit_bytes=vmem_limit),
    )(x, x, ph, pwt, eh, ewt)

    # Only trims the padded tail rows of the last tile (no layout change).
    return out[:, :Hf, :][None]


def reference(rgb, num_bins, K, S):
    """Pure-JAX mirror of the PyTorch forward (for validation)."""
    pad = (K - 1) // 2
    r, g, b = rgb[:, 0:1], rgb[:, 1:2], rgb[:, 2:3]
    mean = (rgb[0, 0] + rgb[0, 1] + rgb[0, 2]) / 3.0
    idx = jnp.floor(mean / 256.0 * num_bins).astype(jnp.int32)
    onehot = jax.nn.one_hot(idx, num_bins, dtype=jnp.float32)        # [H,W,nb]
    intensity = jnp.transpose(onehot, (2, 0, 1))[None]               # [1,nb,H,W]
    w = jnp.ones((num_bins, 1, K, K), jnp.float32)

    def conv(xv):
        return lax.conv_general_dilated(
            xv, w, window_strides=(S, S), padding=((pad, pad), (pad, pad)),
            feature_group_count=num_bins,
            dimension_numbers=("NCHW", "OIHW", "NCHW"))

    rc = conv(r * intensity)[0]
    gc = conv(g * intensity)[0]
    bc = conv(b * intensity)[0]
    ic = conv(intensity)[0]                                          # [nb,Ho,Wo]
    imax = jnp.max(ic, axis=0)
    iarg = jnp.argmax(ic, axis=0)

    def sel(xv):
        hw_last = jnp.transpose(xv, (1, 2, 0))                       # [Ho,Wo,nb]
        return jnp.take_along_axis(hw_last, iarg[..., None], axis=-1)[..., 0]

    rs, gs, bs = sel(rc) / imax, sel(gc) / imax, sel(bc) / imax
    small = jnp.stack([rs, gs, bs], axis=0)[None]                    # [1,3,Ho,Wo]
    return jnp.repeat(jnp.repeat(small, S, axis=2), S, axis=3)


if __name__ == "__main__":
    key = jax.random.PRNGKey(0)
    configs = [
        # (H, W, nb, K, S, row_blocks to exercise)
        dict(H=64, W=64, nb=4, K=3, S=16, row_blocks=(None, 2, 3, 4)),
        dict(H=80, W=96, nb=4, K=5, S=8, row_blocks=(None,)),
    ]
    for cfg in configs:
        key, sub = jax.random.split(key)
        # values in [0, 255): matches the /256*num_bins binning in the module
        rgb = jax.random.uniform(sub, (1, 3, cfg["H"], cfg["W"]),
                                 jnp.float32, 0.0, 255.0)
        ref = reference(rgb, cfg["nb"], cfg["K"], cfg["S"])
        for rb in cfg["row_blocks"]:
            out = jax.block_until_ready(pixel_effect(
                rgb, param_num_bins=cfg["nb"], param_kernel_size=cfg["K"],
                param_pixel_size=cfg["S"], row_block=rb))
            assert out.shape == ref.shape, (out.shape, ref.shape)
            if not bool(jnp.allclose(out, ref, rtol=1e-5, atol=1e-3)):
                raise AssertionError(
                    f"Pallas kernel mismatch (cfg={cfg}, row_block={rb})")
    print("KERNEL_OK")
</pallas_src>

<mosaic_0001>
module attributes {stable_mosaic.version = 11 : i64} {
  func.func @_pixel_effect_kernel(%arg0: i32, %arg1: memref<3x32x64xf32, #tpu.memory_space<vmem>>, %arg2: memref<3x8x64xf32, #tpu.memory_space<vmem>>, %arg3: memref<2x32xf32, #tpu.memory_space<vmem>>, %arg4: memref<64x4xf32, #tpu.memory_space<vmem>>, %arg5: memref<32x2xf32, #tpu.memory_space<vmem>>, %arg6: memref<4x64xf32, #tpu.memory_space<vmem>>, %arg7: memref<3x32x64xf32, #tpu.memory_space<vmem>>) attributes {dimension_semantics = [#tpu.dimension_semantics<parallel>], iteration_bounds = array<i64: 2>, scalar_prefetch = 0 : i64, scratch_operands = 0 : i64, tpu.core_type = #tpu.core_type<tc>, window_params = [{transform_indices = @transform_0, window_bounds = array<i64: 3, 32, 64>}, {transform_indices = @transform_1, window_bounds = array<i64: 3, 8, 64>}, {pipeline_mode = #tpu.pipeline_mode<synchronous>, transform_indices = @transform_2, window_bounds = array<i64: 2, 32>}, {pipeline_mode = #tpu.pipeline_mode<synchronous>, transform_indices = @transform_3, window_bounds = array<i64: 64, 4>}, {pipeline_mode = #tpu.pipeline_mode<synchronous>, transform_indices = @transform_4, window_bounds = array<i64: 32, 2>}, {pipeline_mode = #tpu.pipeline_mode<synchronous>, transform_indices = @transform_5, window_bounds = array<i64: 4, 64>}, {transform_indices = @transform_6, window_bounds = array<i64: 3, 32, 64>}]} {
    %c0 = arith.constant 0 : index
    %c0_0 = arith.constant 0 : index
    %c0_1 = arith.constant 0 : index
    %0 = vector.load %arg1[%c0, %c0_0, %c0_1] : memref<3x32x64xf32, #tpu.memory_space<vmem>>, vector<1x32x64xf32>
    %1 = vector.shape_cast %0 : vector<1x32x64xf32> to vector<32x64xf32>
    %c1 = arith.constant 1 : index
    %c0_2 = arith.constant 0 : index
    %c0_3 = arith.constant 0 : index
    %2 = vector.load %arg1[%c1, %c0_2, %c0_3] : memref<3x32x64xf32, #tpu.memory_space<vmem>>, vector<1x32x64xf32>
    %3 = vector.shape_cast %2 : vector<1x32x64xf32> to vector<32x64xf32>
    %c2 = arith.constant 2 : index
    %c0_4 = arith.constant 0 : index
    %c0_5 = arith.constant 0 : index
    %4 = vector.load %arg1[%c2, %c0_4, %c0_5] : memref<3x32x64xf32, #tpu.memory_space<vmem>>, vector<1x32x64xf32>
    %5 = vector.shape_cast %4 : vector<1x32x64xf32> to vector<32x64xf32>
    %c32_i32 = arith.constant 32 : i32
    %6 = arith.muli %arg0, %c32_i32 : i32
    %7 = tpu.iota {dimensions = array<i32: 0>} : vector<32x64xi32>
    %8 = vector.broadcast %6 : i32 to vector<32x64xi32>
    %9 = arith.addi %8, %7 : vector<32x64xi32>
    %c64_i32 = arith.constant 64 : i32
    %10 = vector.broadcast %c64_i32 : i32 to vector<32x64xi32>
    %11 = arith.cmpi slt, %9, %10 : vector<32x64xi32>
    %12 = arith.addf %1, %3 : vector<32x64xf32>
    %13 = arith.addf %12, %5 : vector<32x64xf32>
    %cst = arith.constant 3.000000e+00 : f32
    %14 = vector.broadcast %cst : f32 to vector<32x64xf32>
    %15 = arith.divf %13, %14 : vector<32x64xf32>
    %cst_6 = arith.constant 2.560000e+02 : f32
    %16 = vector.broadcast %cst_6 : f32 to vector<32x64xf32>
    %17 = arith.divf %15, %16 : vector<32x64xf32>
    %cst_7 = arith.constant 4.000000e+00 : f32
    %18 = vector.broadcast %cst_7 : f32 to vector<32x64xf32>
    %19 = arith.mulf %17, %18 : vector<32x64xf32>
    %20 = math.floor %19 : vector<32x64xf32>
    %21 = arith.fptosi %20 : vector<32x64xf32> to vector<32x64xi32>
    %c0_8 = arith.constant 0 : index
    %c7 = arith.constant 7 : index
    %c0_9 = arith.constant 0 : index
    %22 = vector.load %arg2[%c0_8, %c7, %c0_9] : memref<3x8x64xf32, #tpu.memory_space<vmem>>, vector<1x1x64xf32>
    %23 = vector.shape_cast %22 : vector<1x1x64xf32> to vector<1x64xf32>
    %c1_10 = arith.constant 1 : index
    %c7_11 = arith.constant 7 : index
    %c0_12 = arith.constant 0 : index
    %24 = vector.load %arg2[%c1_10, %c7_11, %c0_12] : memref<3x8x64xf32, #tpu.memory_space<vmem>>, vector<1x1x64xf32>
    %25 = vector.shape_cast %24 : vector<1x1x64xf32> to vector<1x64xf32>
    %c2_13 = arith.constant 2 : index
    %c7_14 = arith.constant 7 : index
    %c0_15 = arith.constant 0 : index
    %26 = vector.load %arg2[%c2_13, %c7_14, %c0_15] : memref<3x8x64xf32, #tpu.memory_space<vmem>>, vector<1x1x64xf32>
    %27 = vector.shape_cast %26 : vector<1x1x64xf32> to vector<1x64xf32>
    %28 = arith.addf %23, %25 : vector<1x64xf32>
    %29 = arith.addf %28, %27 : vector<1x64xf32>
    %cst_16 = arith.constant 3.000000e+00 : f32
    %30 = vector.broadcast %cst_16 : f32 to vector<1x64xf32>
    %31 = arith.divf %29, %30 : vector<1x64xf32>
    %cst_17 = arith.constant 2.560000e+02 : f32
    %32 = vector.broadcast %cst_17 : f32 to vector<1x64xf32>
    %33 = arith.divf %31, %32 : vector<1x64xf32>
    %cst_18 = arith.constant 4.000000e+00 : f32
    %34 = vector.broadcast %cst_18 : f32 to vector<1x64xf32>
    %35 = arith.mulf %33, %34 : vector<1x64xf32>
    %36 = math.floor %35 : vector<1x64xf32>
    %37 = arith.fptosi %36 : vector<1x64xf32> to vector<1x64xi32>
    %c0_i32 = arith.constant 0 : i32
    %38 = arith.cmpi sgt, %arg0, %c0_i32 : i32
    %39 = tpu.iota {dimensions = array<i32: 0>} : vector<2x1xi32>
    %c0_i32_19 = arith.constant 0 : i32
    %40 = vector.broadcast %c0_i32_19 : i32 to vector<2x1xi32>
    %41 = arith.cmpi eq, %39, %40 : vector<2x1xi32>
    %42 = arith.extui %41 : vector<2x1xi1> to vector<2x1xi32>
    %43 = arith.sitofp %42 : vector<2x1xi32> to vector<2x1xf32>
    %c0_20 = arith.constant 0 : index
    %c0_21 = arith.constant 0 : index
    %44 = vector.load %arg3[%c0_20, %c0_21] : memref<2x32xf32, #tpu.memory_space<vmem>>, vector<2x32xf32>
    %c0_i32_22 = arith.constant 0 : i32
    %45 = vector.broadcast %c0_i32_22 : i32 to vector<32x64xi32>
    %46 = arith.cmpi eq, %21, %45 : vector<32x64xi32>
    %47 = arith.andi %46, %11 : vector<32x64xi1>
    %48 = arith.extui %47 : vector<32x64xi1> to vector<32x64xi32>
    %49 = arith.sitofp %48 : vector<32x64xi32> to vector<32x64xf32>
    %cst_23 = arith.constant 0.000000e+00 : f32
    %50 = vector.broadcast %cst_23 : f32 to vector<32x64xf32>
    %51 = arith.select %47, %1, %50 : vector<32x64xi1>, vector<32x64xf32>
    %cst_24 = arith.constant 0.000000e+00 : f32
    %52 = vector.broadcast %cst_24 : f32 to vector<32x64xf32>
    %53 = arith.select %47, %3, %52 : vector<32x64xi1>, vector<32x64xf32>
    %cst_25 = arith.constant 0.000000e+00 : f32
    %54 = vector.broadcast %cst_25 : f32 to vector<32x64xf32>
    %55 = arith.select %47, %5, %54 : vector<32x64xi1>, vector<32x64xf32>
    %cst_26 = arith.constant dense<0.000000e+00> : vector<2x64xf32>
    %56 = tpu.matmul %44, %49, %cst_26 {dimension_numbers = #tpu.dot_dimension_numbers<[1], [0], [0], [1], [0, 0, 1, 1], [], []>} : vector<2x32xf32>, vector<32x64xf32>, vector<2x64xf32> -> vector<2x64xf32>
    %cst_27 = arith.constant dense<0.000000e+00> : vector<2x64xf32>
    %57 = tpu.matmul %44, %51, %cst_27 {dimension_numbers = #tpu.dot_dimension_numbers<[1], [0], [0], [1], [0, 0, 1, 1], [], []>} : vector<2x32xf32>, vector<32x64xf32>, vector<2x64xf32> -> vector<2x64xf32>
    %cst_28 = arith.constant dense<0.000000e+00> : vector<2x64xf32>
    %58 = tpu.matmul %44, %53, %cst_28 {dimension_numbers = #tpu.dot_dimension_numbers<[1], [0], [0], [1], [0, 0, 1, 1], [], []>} : vector<2x32xf32>, vector<32x64xf32>, vector<2x64xf32> -> vector<2x64xf32>
    %cst_29 = arith.constant dense<0.000000e+00> : vector<2x64xf32>
    %59 = tpu.matmul %44, %55, %cst_29 {dimension_numbers = #tpu.dot_dimension_numbers<[1], [0], [0], [1], [0, 0, 1, 1], [], []>} : vector<2x32xf32>, vector<32x64xf32>, vector<2x64xf32> -> vector<2x64xf32>
    %c0_i32_30 = arith.constant 0 : i32
    %60 = vector.broadcast %c0_i32_30 : i32 to vector<1x64xi32>
    %61 = arith.cmpi eq, %37, %60 : vector<1x64xi32>
    %62 = vector.broadcast %38 : i1 to vector<1x64xi1>
    %63 = arith.andi %61, %62 : vector<1x64xi1>
    %64 = arith.extui %63 : vector<1x64xi1> to vector<1x64xi32>
    %65 = arith.sitofp %64 : vector<1x64xi32> to vector<1x64xf32>
    %cst_31 = arith.constant dense<0.000000e+00> : vector<64xf32>
    %66 = vector.multi_reduction <add>, %65, %cst_31 [0] : vector<1x64xf32> to vector<64xf32>
    %67 = vector.shape_cast %66 : vector<64xf32> to vector<1x64xf32>
    %68 = vector.broadcast %43 : vector<2x1xf32> to vector<2x64xf32>
    %69 = vector.broadcast %67 : vector<1x64xf32> to vector<2x64xf32>
    %70 = arith.mulf %68, %69 : vector<2x64xf32>
    %71 = arith.addf %56, %70 : vector<2x64xf32>
    %cst_32 = arith.constant 0.000000e+00 : f32
    %72 = vector.broadcast %cst_32 : f32 to vector<1x64xf32>
    %73 = arith.select %63, %23, %72 : vector<1x64xi1>, vector<1x64xf32>
    %cst_33 = arith.constant dense<0.000000e+00> : vector<64xf32>
    %74 = vector.multi_reduction <add>, %73, %cst_33 [0] : vector<1x64xf32> to vector<64xf32>
    %75 = vector.shape_cast %74 : vector<64xf32> to vector<1x64xf32>
    %76 = vector.broadcast %43 : vector<2x1xf32> to vector<2x64xf32>
    %77 = vector.broadcast %75 : vector<1x64xf32> to vector<2x64xf32>
    %78 = arith.mulf %76, %77 : vector<2x64xf32>
    %79 = arith.addf %57, %78 : vector<2x64xf32>
    %cst_34 = arith.constant 0.000000e+00 : f32
    %80 = vector.broadcast %cst_34 : f32 to vector<1x64xf32>
    %81 = arith.select %63, %25, %80 : vector<1x64xi1>, vector<1x64xf32>
    %cst_35 = arith.constant dense<0.000000e+00> : vector<64xf32>
    %82 = vector.multi_reduction <add>, %81, %cst_35 [0] : vector<1x64xf32> to vector<64xf32>
    %83 = vector.shape_cast %82 : vector<64xf32> to vector<1x64xf32>
    %84 = vector.broadcast %43 : vector<2x1xf32> to vector<2x64xf32>
    %85 = vector.broadcast %83 : vector<1x64xf32> to vector<2x64xf32>
    %86 = arith.mulf %84, %85 : vector<2x64xf32>
    %87 = arith.addf %58, %86 : vector<2x64xf32>
    %cst_36 = arith.constant 0.000000e+00 : f32
    %88 = vector.broadcast %cst_36 : f32 to vector<1x64xf32>
    %89 = arith.select %63, %27, %88 : vector<1x64xi1>, vector<1x64xf32>
    %cst_37 = arith.constant dense<0.000000e+00> : vector<64xf32>
    %90 = vector.multi_reduction <add>, %89, %cst_37 [0] : vector<1x64xf32> to vector<64xf32>
    %91 = vector.shape_cast %90 : vector<64xf32> to vector<1x64xf32>
    %92 = vector.broadcast %43 : vector<2x1xf32> to vector<2x64xf32>
    %93 = vector.broadcast %91 : vector<1x64xf32> to vector<2x64xf32>
    %94 = arith.mulf %92, %93 : vector<2x64xf32>
    %95 = arith.addf %59, %94 : vector<2x64xf32>
    %c1_i32 = arith.constant 1 : i32
    %96 = vector.broadcast %c1_i32 : i32 to vector<32x64xi32>
    %97 = arith.cmpi eq, %21, %96 : vector<32x64xi32>
    %98 = arith.andi %97, %11 : vector<32x64xi1>
    %99 = arith.extui %98 : vector<32x64xi1> to vector<32x64xi32>
    %100 = arith.sitofp %99 : vector<32x64xi32> to vector<32x64xf32>
    %cst_38 = arith.constant 0.000000e+00 : f32
    %101 = vector.broadcast %cst_38 : f32 to vector<32x64xf32>
    %102 = arith.select %98, %1, %101 : vector<32x64xi1>, vector<32x64xf32>
    %cst_39 = arith.constant 0.000000e+00 : f32
    %103 = vector.broadcast %cst_39 : f32 to vector<32x64xf32>
    %104 = arith.select %98, %3, %103 : vector<32x64xi1>, vector<32x64xf32>
    %cst_40 = arith.constant 0.000000e+00 : f32
    %105 = vector.broadcast %cst_40 : f32 to vector<32x64xf32>
    %106 = arith.select %98, %5, %105 : vector<32x64xi1>, vector<32x64xf32>
    %cst_41 = arith.constant dense<0.000000e+00> : vector<2x64xf32>
    %107 = tpu.matmul %44, %100, %cst_41 {dimension_numbers = #tpu.dot_dimension_numbers<[1], [0], [0], [1], [0, 0, 1, 1], [], []>} : vector<2x32xf32>, vector<32x64xf32>, vector<2x64xf32> -> vector<2x64xf32>
    %cst_42 = arith.constant dense<0.000000e+00> : vector<2x64xf32>
    %108 = tpu.matmul %44, %102, %cst_42 {dimension_numbers = #tpu.dot_dimension_numbers<[1], [0], [0], [1], [0, 0, 1, 1], [], []>} : vector<2x32xf32>, vector<32x64xf32>, vector<2x64xf32> -> vector<2x64xf32>
    %cst_43 = arith.constant dense<0.000000e+00> : vector<2x64xf32>
    %109 = tpu.matmul %44, %104, %cst_43 {dimension_numbers = #tpu.dot_dimension_numbers<[1], [0], [0], [1], [0, 0, 1, 1], [], []>} : vector<2x32xf32>, vector<32x64xf32>, vector<2x64xf32> -> vector<2x64xf32>
    %cst_44 = arith.constant dense<0.000000e+00> : vector<2x64xf32>
    %110 = tpu.matmul %44, %106, %cst_44 {dimension_numbers = #tpu.dot_dimension_numbers<[1], [0], [0], [1], [0, 0, 1, 1], [], []>} : vector<2x32xf32>, vector<32x64xf32>, vector<2x64xf32> -> vector<2x64xf32>
    %c1_i32_45 = arith.constant 1 : i32
    %111 = vector.broadcast %c1_i32_45 : i32 to vector<1x64xi32>
    %112 = arith.cmpi eq, %37, %111 : vector<1x64xi32>
    %113 = vector.broadcast %38 : i1 to vector<1x64xi1>
    %114 = arith.andi %112, %113 : vector<1x64xi1>
    %115 = arith.extui %114 : vector<1x64xi1> to vector<1x64xi32>
    %116 = arith.sitofp %115 : vector<1x64xi32> to vector<1x64xf32>
    %cst_46 = arith.constant dense<0.000000e+00> : vector<64xf32>
    %117 = vector.multi_reduction <add>, %116, %cst_46 [0] : vector<1x64xf32> to vector<64xf32>
    %118 = vector.shape_cast %117 : vector<64xf32> to vector<1x64xf32>
    %119 = vector.broadcast %43 : vector<2x1xf32> to vector<2x64xf32>
    %120 = vector.broadcast %118 : vector<1x64xf32> to vector<2x64xf32>
    %121 = arith.mulf %119, %120 : vector<2x64xf32>
    %122 = arith.addf %107, %121 : vector<2x64xf32>
    %cst_47 = arith.constant 0.000000e+00 : f32
    %123 = vector.broadcast %cst_47 : f32 to vector<1x64xf32>
    %124 = arith.select %114, %23, %123 : vector<1x64xi1>, vector<1x64xf32>
    %cst_48 = arith.constant dense<0.000000e+00> : vector<64xf32>
    %125 = vector.multi_reduction <add>, %124, %cst_48 [0] : vector<1x64xf32> to vector<64xf32>
    %126 = vector.shape_cast %125 : vector<64xf32> to vector<1x64xf32>
    %127 = vector.broadcast %43 : vector<2x1xf32> to vector<2x64xf32>
    %128 = vector.broadcast %126 : vector<1x64xf32> to vector<2x64xf32>
    %129 = arith.mulf %127, %128 : vector<2x64xf32>
    %130 = arith.addf %108, %129 : vector<2x64xf32>
    %cst_49 = arith.constant 0.000000e+00 : f32
    %131 = vector.broadcast %cst_49 : f32 to vector<1x64xf32>
    %132 = arith.select %114, %25, %131 : vector<1x64xi1>, vector<1x64xf32>
    %cst_50 = arith.constant dense<0.000000e+00> : vector<64xf32>
    %133 = vector.multi_reduction <add>, %132, %cst_50 [0] : vector<1x64xf32> to vector<64xf32>
    %134 = vector.shape_cast %133 : vector<64xf32> to vector<1x64xf32>
    %135 = vector.broadcast %43 : vector<2x1xf32> to vector<2x64xf32>
    %136 = vector.broadcast %134 : vector<1x64xf32> to vector<2x64xf32>
    %137 = arith.mulf %135, %136 : vector<2x64xf32>
    %138 = arith.addf %109, %137 : vector<2x64xf32>
    %cst_51 = arith.constant 0.000000e+00 : f32
    %139 = vector.broadcast %cst_51 : f32 to vector<1x64xf32>
    %140 = arith.select %114, %27, %139 : vector<1x64xi1>, vector<1x64xf32>
    %cst_52 = arith.constant dense<0.000000e+00> : vector<64xf32>
    %141 = vector.multi_reduction <add>, %140, %cst_52 [0] : vector<1x64xf32> to vector<64xf32>
    %142 = vector.shape_cast %141 : vector<64xf32> to vector<1x64xf32>
    %143 = vector.broadcast %43 : vector<2x1xf32> to vector<2x64xf32>
    %144 = vector.broadcast %142 : vector<1x64xf32> to vector<2x64xf32>
    %145 = arith.mulf %143, %144 : vector<2x64xf32>
    %146 = arith.addf %110, %145 : vector<2x64xf32>
    %c2_i32 = arith.constant 2 : i32
    %147 = vector.broadcast %c2_i32 : i32 to vector<32x64xi32>
    %148 = arith.cmpi eq, %21, %147 : vector<32x64xi32>
    %149 = arith.andi %148, %11 : vector<32x64xi1>
    %150 = arith.extui %149 : vector<32x64xi1> to vector<32x64xi32>
    %151 = arith.sitofp %150 : vector<32x64xi32> to vector<32x64xf32>
    %cst_53 = arith.constant 0.000000e+00 : f32
    %152 = vector.broadcast %cst_53 : f32 to vector<32x64xf32>
    %153 = arith.select %149, %1, %152 : vector<32x64xi1>, vector<32x64xf32>
    %cst_54 = arith.constant 0.000000e+00 : f32
    %154 = vector.broadcast %cst_54 : f32 to vector<32x64xf32>
    %155 = arith.select %149, %3, %154 : vector<32x64xi1>, vector<32x64xf32>
    %cst_55 = arith.constant 0.000000e+00 : f32
    %156 = vector.broadcast %cst_55 : f32 to vector<32x64xf32>
    %157 = arith.select %149, %5, %156 : vector<32x64xi1>, vector<32x64xf32>
    %cst_56 = arith.constant dense<0.000000e+00> : vector<2x64xf32>
    %158 = tpu.matmul %44, %151, %cst_56 {dimension_numbers = #tpu.dot_dimension_numbers<[1], [0], [0], [1], [0, 0, 1, 1], [], []>} : vector<2x32xf32>, vector<32x64xf32>, vector<2x64xf32> -> vector<2x64xf32>
    %cst_57 = arith.constant dense<0.000000e+00> : vector<2x64xf32>
    %159 = tpu.matmul %44, %153, %cst_57 {dimension_numbers = #tpu.dot_dimension_numbers<[1], [0], [0], [1], [0, 0, 1, 1], [], []>} : vector<2x32xf32>, vector<32x64xf32>, vector<2x64xf32> -> vector<2x64xf32>
    %cst_58 = arith.constant dense<0.000000e+00> : vector<2x64xf32>
    %160 = tpu.matmul %44, %155, %cst_58 {dimension_numbers = #tpu.dot_dimension_numbers<[1], [0], [0], [1], [0, 0, 1, 1], [], []>} : vector<2x32xf32>, vector<32x64xf32>, vector<2x64xf32> -> vector<2x64xf32>
    %cst_59 = arith.constant dense<0.000000e+00> : vector<2x64xf32>
    %161 = tpu.matmul %44, %157, %cst_59 {dimension_numbers = #tpu.dot_dimension_numbers<[1], [0], [0], [1], [0, 0, 1, 1], [], []>} : vector<2x32xf32>, vector<32x64xf32>, vector<2x64xf32> -> vector<2x64xf32>
    %c2_i32_60 = arith.constant 2 : i32
    %162 = vector.broadcast %c2_i32_60 : i32 to vector<1x64xi32>
    %163 = arith.cmpi eq, %37, %162 : vector<1x64xi32>
    %164 = vector.broadcast %38 : i1 to vector<1x64xi1>
    %165 = arith.andi %163, %164 : vector<1x64xi1>
    %166 = arith.extui %165 : vector<1x64xi1> to vector<1x64xi32>
    %167 = arith.sitofp %166 : vector<1x64xi32> to vector<1x64xf32>
    %cst_61 = arith.constant dense<0.000000e+00> : vector<64xf32>
    %168 = vector.multi_reduction <add>, %167, %cst_61 [0] : vector<1x64xf32> to vector<64xf32>
    %169 = vector.shape_cast %168 : vector<64xf32> to vector<1x64xf32>
    %170 = vector.broadcast %43 : vector<2x1xf32> to vector<2x64xf32>
    %171 = vector.broadcast %169 : vector<1x64xf32> to vector<2x64xf32>
    %172 = arith.mulf %170, %171 : vector<2x64xf32>
    %173 = arith.addf %158, %172 : vector<2x64xf32>
    %cst_62 = arith.constant 0.000000e+00 : f32
    %174 = vector.broadcast %cst_62 : f32 to vector<1x64xf32>
    %175 = arith.select %165, %23, %174 : vector<1x64xi1>, vector<1x64xf32>
    %cst_63 = arith.constant dense<0.000000e+00> : vector<64xf32>
    %176 = vector.multi_reduction <add>, %175, %cst_63 [0] : vector<1x64xf32> to vector<64xf32>
    %177 = vector.shape_cast %176 : vector<64xf32> to vector<1x64xf32>
    %178 = vector.broadcast %43 : vector<2x1xf32> to vector<2x64xf32>
    %179 = vector.broadcast %177 : vector<1x64xf32> to vector<2x64xf32>
    %180 = arith.mulf %178, %179 : vector<2x64xf32>
    %181 = arith.addf %159, %180 : vector<2x64xf32>
    %cst_64 = arith.constant 0.000000e+00 : f32
    %182 = vector.broadcast %cst_64 : f32 to vector<1x64xf32>
    %183 = arith.select %165, %25, %182 : vector<1x64xi1>, vector<1x64xf32>
    %cst_65 = arith.constant dense<0.000000e+00> : vector<64xf32>
    %184 = vector.multi_reduction <add>, %183, %cst_65 [0] : vector<1x64xf32> to vector<64xf32>
    %185 = vector.shape_cast %184 : vector<64xf32> to vector<1x64xf32>
    %186 = vector.broadcast %43 : vector<2x1xf32> to vector<2x64xf32>
    %187 = vector.broadcast %185 : vector<1x64xf32> to vector<2x64xf32>
    %188 = arith.mulf %186, %187 : vector<2x64xf32>
    %189 = arith.addf %160, %188 : vector<2x64xf32>
    %cst_66 = arith.constant 0.000000e+00 : f32
    %190 = vector.broadcast %cst_66 : f32 to vector<1x64xf32>
    %191 = arith.select %165, %27, %190 : vector<1x64xi1>, vector<1x64xf32>
    %cst_67 = arith.constant dense<0.000000e+00> : vector<64xf32>
    %192 = vector.multi_reduction <add>, %191, %cst_67 [0] : vector<1x64xf32> to vector<64xf32>
    %193 = vector.shape_cast %192 : vector<64xf32> to vector<1x64xf32>
    %194 = vector.broadcast %43 : vector<2x1xf32> to vector<2x64xf32>
    %195 = vector.broadcast %193 : vector<1x64xf32> to vector<2x64xf32>
    %196 = arith.mulf %194, %195 : vector<2x64xf32>
    %197 = arith.addf %161, %196 : vector<2x64xf32>
    %c3_i32 = arith.constant 3 : i32
    %198 = vector.broadcast %c3_i32 : i32 to vector<32x64xi32>
    %199 = arith.cmpi eq, %21, %198 : vector<32x64xi32>
    %200 = arith.andi %199, %11 : vector<32x64xi1>
    %201 = arith.extui %200 : vector<32x64xi1> to vector<32x64xi32>
    %202 = arith.sitofp %201 : vector<32x64xi32> to vector<32x64xf32>
    %cst_68 = arith.constant 0.000000e+00 : f32
    %203 = vector.broadcast %cst_68 : f32 to vector<32x64xf32>
    %204 = arith.select %200, %1, %203 : vector<32x64xi1>, vector<32x64xf32>
    %cst_69 = arith.constant 0.000000e+00 : f32
    %205 = vector.broadcast %cst_69 : f32 to vector<32x64xf32>
    %206 = arith.select %200, %3, %205 : vector<32x64xi1>, vector<32x64xf32>
    %cst_70 = arith.constant 0.000000e+00 : f32
    %207 = vector.broadcast %cst_70 : f32 to vector<32x64xf32>
    %208 = arith.select %200, %5, %207 : vector<32x64xi1>, vector<32x64xf32>
    %cst_71 = arith.constant dense<0.000000e+00> : vector<2x64xf32>
    %209 = tpu.matmul %44, %202, %cst_71 {dimension_numbers = #tpu.dot_dimension_numbers<[1], [0], [0], [1], [0, 0, 1, 1], [], []>} : vector<2x32xf32>, vector<32x64xf32>, vector<2x64xf32> -> vector<2x64xf32>
    %cst_72 = arith.constant dense<0.000000e+00> : vector<2x64xf32>
    %210 = tpu.matmul %44, %204, %cst_72 {dimension_numbers = #tpu.dot_dimension_numbers<[1], [0], [0], [1], [0, 0, 1, 1], [], []>} : vector<2x32xf32>, vector<32x64xf32>, vector<2x64xf32> -> vector<2x64xf32>
    %cst_73 = arith.constant dense<0.000000e+00> : vector<2x64xf32>
    %211 = tpu.matmul %44, %206, %cst_73 {dimension_numbers = #tpu.dot_dimension_numbers<[1], [0], [0], [1], [0, 0, 1, 1], [], []>} : vector<2x32xf32>, vector<32x64xf32>, vector<2x64xf32> -> vector<2x64xf32>
    %cst_74 = arith.constant dense<0.000000e+00> : vector<2x64xf32>
    %212 = tpu.matmul %44, %208, %cst_74 {dimension_numbers = #tpu.dot_dimension_numbers<[1], [0], [0], [1], [0, 0, 1, 1], [], []>} : vector<2x32xf32>, vector<32x64xf32>, vector<2x64xf32> -> vector<2x64xf32>
    %c3_i32_75 = arith.constant 3 : i32
    %213 = vector.broadcast %c3_i32_75 : i32 to vector<1x64xi32>
    %214 = arith.cmpi eq, %37, %213 : vector<1x64xi32>
    %215 = vector.broadcast %38 : i1 to vector<1x64xi1>
    %216 = arith.andi %214, %215 : vector<1x64xi1>
    %217 = arith.extui %216 : vector<1x64xi1> to vector<1x64xi32>
    %218 = arith.sitofp %217 : vector<1x64xi32> to vector<1x64xf32>
    %cst_76 = arith.constant dense<0.000000e+00> : vector<64xf32>
    %219 = vector.multi_reduction <add>, %218, %cst_76 [0] : vector<1x64xf32> to vector<64xf32>
    %220 = vector.shape_cast %219 : vector<64xf32> to vector<1x64xf32>
    %221 = vector.broadcast %43 : vector<2x1xf32> to vector<2x64xf32>
    %222 = vector.broadcast %220 : vector<1x64xf32> to vector<2x64xf32>
    %223 = arith.mulf %221, %222 : vector<2x64xf32>
    %224 = arith.addf %209, %223 : vector<2x64xf32>
    %cst_77 = arith.constant 0.000000e+00 : f32
    %225 = vector.broadcast %cst_77 : f32 to vector<1x64xf32>
    %226 = arith.select %216, %23, %225 : vector<1x64xi1>, vector<1x64xf32>
    %cst_78 = arith.constant dense<0.000000e+00> : vector<64xf32>
    %227 = vector.multi_reduction <add>, %226, %cst_78 [0] : vector<1x64xf32> to vector<64xf32>
    %228 = vector.shape_cast %227 : vector<64xf32> to vector<1x64xf32>
    %229 = vector.broadcast %43 : vector<2x1xf32> to vector<2x64xf32>
    %230 = vector.broadcast %228 : vector<1x64xf32> to vector<2x64xf32>
    %231 = arith.mulf %229, %230 : vector<2x64xf32>
    %232 = arith.addf %210, %231 : vector<2x64xf32>
    %cst_79 = arith.constant 0.000000e+00 : f32
    %233 = vector.broadcast %cst_79 : f32 to vector<1x64xf32>
    %234 = arith.select %216, %25, %233 : vector<1x64xi1>, vector<1x64xf32>
    %cst_80 = arith.constant dense<0.000000e+00> : vector<64xf32>
    %235 = vector.multi_reduction <add>, %234, %cst_80 [0] : vector<1x64xf32> to vector<64xf32>
    %236 = vector.shape_cast %235 : vector<64xf32> to vector<1x64xf32>
    %237 = vector.broadcast %43 : vector<2x1xf32> to vector<2x64xf32>
    %238 = vector.broadcast %236 : vector<1x64xf32> to vector<2x64xf32>
    %239 = arith.mulf %237, %238 : vector<2x64xf32>
    %240 = arith.addf %211, %239 : vector<2x64xf32>
    %cst_81 = arith.constant 0.000000e+00 : f32
    %241 = vector.broadcast %cst_81 : f32 to vector<1x64xf32>
    %242 = arith.select %216, %27, %241 : vector<1x64xi1>, vector<1x64xf32>
    %cst_82 = arith.constant dense<0.000000e+00> : vector<64xf32>
    %243 = vector.multi_reduction <add>, %242, %cst_82 [0] : vector<1x64xf32> to vector<64xf32>
    %244 = vector.shape_cast %243 : vector<64xf32> to vector<1x64xf32>
    %245 = vector.broadcast %43 : vector<2x1xf32> to vector<2x64xf32>
    %246 = vector.broadcast %244 : vector<1x64xf32> to vector<2x64xf32>
    %247 = arith.mulf %245, %246 : vector<2x64xf32>
    %248 = arith.addf %212, %247 : vector<2x64xf32>
    %249 = tpu.concatenate %71, %79, %87, %95, %122, %130, %138, %146, %173, %181, %189, %197, %224, %232, %240, %248 in 0 : vector<2x64xf32>, vector<2x64xf32>, vector<2x64xf32>, vector<2x64xf32>, vector<2x64xf32>, vector<2x64xf32>, vector<2x64xf32>, vector<2x64xf32>, vector<2x64xf32>, vector<2x64xf32>, vector<2x64xf32>, vector<2x64xf32>, vector<2x64xf32>, vector<2x64xf32>, vector<2x64xf32>, vector<2x64xf32> -> vector<32x64xf32>
    %c0_83 = arith.constant 0 : index
    %c0_84 = arith.constant 0 : index
    %250 = vector.load %arg4[%c0_83, %c0_84] : memref<64x4xf32, #tpu.memory_space<vmem>>, vector<64x4xf32>
    %cst_85 = arith.constant dense<0.000000e+00> : vector<32x4xf32>
    %251 = tpu.matmul %249, %250, %cst_85 {dimension_numbers = #tpu.dot_dimension_numbers<[1], [0], [0], [1], [0, 0, 1, 1], [], []>} : vector<32x64xf32>, vector<64x4xf32>, vector<32x4xf32> -> vector<32x4xf32>
    %252 = vector.extract_strided_slice %251 {offsets = [0, 0], sizes = [2, 4], strides = [1, 1]} : vector<32x4xf32> to vector<2x4xf32>
    %253 = vector.extract_strided_slice %251 {offsets = [2, 0], sizes = [2, 4], strides = [1, 1]} : vector<32x4xf32> to vector<2x4xf32>
    %254 = vector.extract_strided_slice %251 {offsets = [4, 0], sizes = [2, 4], strides = [1, 1]} : vector<32x4xf32> to vector<2x4xf32>
    %255 = vector.extract_strided_slice %251 {offsets = [6, 0], sizes = [2, 4], strides = [1, 1]} : vector<32x4xf32> to vector<2x4xf32>
    %256 = vector.extract_strided_slice %251 {offsets = [8, 0], sizes = [2, 4], strides = [1, 1]} : vector<32x4xf32> to vector<2x4xf32>
    %257 = arith.cmpf ogt, %256, %252 : vector<2x4xf32>
    %258 = vector.extract_strided_slice %251 {offsets = [10, 0], sizes = [2, 4], strides = [1, 1]} : vector<32x4xf32> to vector<2x4xf32>
    %259 = arith.select %257, %258, %253 : vector<2x4xi1>, vector<2x4xf32>
    %260 = vector.extract_strided_slice %251 {offsets = [12, 0], sizes = [2, 4], strides = [1, 1]} : vector<32x4xf32> to vector<2x4xf32>
    %261 = arith.select %257, %260, %254 : vector<2x4xi1>, vector<2x4xf32>
    %262 = vector.extract_strided_slice %251 {offsets = [14, 0], sizes = [2, 4], strides = [1, 1]} : vector<32x4xf32> to vector<2x4xf32>
    %263 = arith.select %257, %262, %255 : vector<2x4xi1>, vector<2x4xf32>
    %264 = arith.select %257, %256, %252 : vector<2x4xi1>, vector<2x4xf32>
    %265 = vector.extract_strided_slice %251 {offsets = [16, 0], sizes = [2, 4], strides = [1, 1]} : vector<32x4xf32> to vector<2x4xf32>
    %266 = arith.cmpf ogt, %265, %264 : vector<2x4xf32>
    %267 = vector.extract_strided_slice %251 {offsets = [18, 0], sizes = [2, 4], strides = [1, 1]} : vector<32x4xf32> to vector<2x4xf32>
    %268 = arith.select %266, %267, %259 : vector<2x4xi1>, vector<2x4xf32>
    %269 = vector.extract_strided_slice %251 {offsets = [20, 0], sizes = [2, 4], strides = [1, 1]} : vector<32x4xf32> to vector<2x4xf32>
    %270 = arith.select %266, %269, %261 : vector<2x4xi1>, vector<2x4xf32>
    %271 = vector.extract_strided_slice %251 {offsets = [22, 0], sizes = [2, 4], strides = [1, 1]} : vector<32x4xf32> to vector<2x4xf32>
    %272 = arith.select %266, %271, %263 : vector<2x4xi1>, vector<2x4xf32>
    %273 = arith.select %266, %265, %264 : vector<2x4xi1>, vector<2x4xf32>
    %274 = vector.extract_strided_slice %251 {offsets = [24, 0], sizes = [2, 4], strides = [1, 1]} : vector<32x4xf32> to vector<2x4xf32>
    %275 = arith.cmpf ogt, %274, %273 : vector<2x4xf32>
    %276 = vector.extract_strided_slice %251 {offsets = [26, 0], sizes = [2, 4], strides = [1, 1]} : vector<32x4xf32> to vector<2x4xf32>
    %277 = arith.select %275, %276, %268 : vector<2x4xi1>, vector<2x4xf32>
    %278 = vector.extract_strided_slice %251 {offsets = [28, 0], sizes = [2, 4], strides = [1, 1]} : vector<32x4xf32> to vector<2x4xf32>
    %279 = arith.select %275, %278, %270 : vector<2x4xi1>, vector<2x4xf32>
    %280 = vector.extract_strided_slice %251 {offsets = [30, 0], sizes = [2, 4], strides = [1, 1]} : vector<32x4xf32> to vector<2x4xf32>
    %281 = arith.select %275, %280, %272 : vector<2x4xi1>, vector<2x4xf32>
    %282 = arith.select %275, %274, %273 : vector<2x4xi1>, vector<2x4xf32>
    %cst_86 = arith.constant 0.000000e+00 : f32
    %283 = vector.broadcast %cst_86 : f32 to vector<2x4xf32>
    %284 = arith.cmpf ogt, %282, %283 : vector<2x4xf32>
    %cst_87 = arith.constant 1.000000e+00 : f32
    %285 = vector.broadcast %cst_87 : f32 to vector<2x4xf32>
    %286 = arith.divf %285, %282 : vector<2x4xf32>
    %cst_88 = arith.constant 0.000000e+00 : f32
    %287 = vector.broadcast %cst_88 : f32 to vector<2x4xf32>
    %288 = arith.select %284, %286, %287 : vector<2x4xi1>, vector<2x4xf32>
    %c0_89 = arith.constant 0 : index
    %c0_90 = arith.constant 0 : index
    %289 = vector.load %arg5[%c0_89, %c0_90] : memref<32x2xf32, #tpu.memory_space<vmem>>, vector<32x2xf32>
    %c0_91 = arith.constant 0 : index
    %c0_92 = arith.constant 0 : index
    %290 = vector.load %arg6[%c0_91, %c0_92] : memref<4x64xf32, #tpu.memory_space<vmem>>, vector<4x64xf32>
    %291 = arith.mulf %277, %288 : vector<2x4xf32>
    %cst_93 = arith.constant dense<0.000000e+00> : vector<2x64xf32>
    %292 = tpu.matmul %291, %290, %cst_93 {dimension_numbers = #tpu.dot_dimension_numbers<[1], [0], [0], [1], [0, 0, 1, 1], [], []>} : vector<2x4xf32>, vector<4x64xf32>, vector<2x64xf32> -> vector<2x64xf32>
    %cst_94 = arith.constant dense<0.000000e+00> : vector<32x64xf32>
    %293 = tpu.matmul %289, %292, %cst_94 {dimension_numbers = #tpu.dot_dimension_numbers<[1], [0], [0], [1], [0, 0, 1, 1], [], []>} : vector<32x2xf32>, vector<2x64xf32>, vector<32x64xf32> -> vector<32x64xf32>
    %c0_95 = arith.constant 0 : index
    %c0_96 = arith.constant 0 : index
    %c0_97 = arith.constant 0 : index
    %294 = vector.load %arg7[%c0_95, %c0_96, %c0_97] : memref<3x32x64xf32, #tpu.memory_space<vmem>>, vector<1x32x64xf32>
    %295 = vector.shape_cast %294 : vector<1x32x64xf32> to vector<32x64xf32>
    %296 = vector.shape_cast %293 : vector<32x64xf32> to vector<1x32x64xf32>
    tpu.vector_store %arg7[%c0_95, %c0_96, %c0_97], %296 {strides = array<i32>} : memref<3x32x64xf32, #tpu.memory_space<vmem>>, vector<1x32x64xf32>,
    %297 = arith.mulf %279, %288 : vector<2x4xf32>
    %cst_98 = arith.constant dense<0.000000e+00> : vector<2x64xf32>
    %298 = tpu.matmul %297, %290, %cst_98 {dimension_numbers = #tpu.dot_dimension_numbers<[1], [0], [0], [1], [0, 0, 1, 1], [], []>} : vector<2x4xf32>, vector<4x64xf32>, vector<2x64xf32> -> vector<2x64xf32>
    %cst_99 = arith.constant dense<0.000000e+00> : vector<32x64xf32>
    %299 = tpu.matmul %289, %298, %cst_99 {dimension_numbers = #tpu.dot_dimension_numbers<[1], [0], [0], [1], [0, 0, 1, 1], [], []>} : vector<32x2xf32>, vector<2x64xf32>, vector<32x64xf32> -> vector<32x64xf32>
    %c1_100 = arith.constant 1 : index
    %c0_101 = arith.constant 0 : index
    %c0_102 = arith.constant 0 : index
    %300 = vector.load %arg7[%c1_100, %c0_101, %c0_102] : memref<3x32x64xf32, #tpu.memory_space<vmem>>, vector<1x32x64xf32>
    %301 = vector.shape_cast %300 : vector<1x32x64xf32> to vector<32x64xf32>
    %302 = vector.shape_cast %299 : vector<32x64xf32> to vector<1x32x64xf32>
    tpu.vector_store %arg7[%c1_100, %c0_101, %c0_102], %302 {strides = array<i32>} : memref<3x32x64xf32, #tpu.memory_space<vmem>>, vector<1x32x64xf32>,
    %303 = arith.mulf %281, %288 : vector<2x4xf32>
    %cst_103 = arith.constant dense<0.000000e+00> : vector<2x64xf32>
    %304 = tpu.matmul %303, %290, %cst_103 {dimension_numbers = #tpu.dot_dimension_numbers<[1], [0], [0], [1], [0, 0, 1, 1], [], []>} : vector<2x4xf32>, vector<4x64xf32>, vector<2x64xf32> -> vector<2x64xf32>
    %cst_104 = arith.constant dense<0.000000e+00> : vector<32x64xf32>
    %305 = tpu.matmul %289, %304, %cst_104 {dimension_numbers = #tpu.dot_dimension_numbers<[1], [0], [0], [1], [0, 0, 1, 1], [], []>} : vector<32x2xf32>, vector<2x64xf32>, vector<32x64xf32> -> vector<32x64xf32>
    %c2_105 = arith.constant 2 : index
    %c0_106 = arith.constant 0 : index
    %c0_107 = arith.constant 0 : index
    %306 = vector.load %arg7[%c2_105, %c0_106, %c0_107] : memref<3x32x64xf32, #tpu.memory_space<vmem>>, vector<1x32x64xf32>
    %307 = vector.shape_cast %306 : vector<1x32x64xf32> to vector<32x64xf32>
    %308 = vector.shape_cast %305 : vector<32x64xf32> to vector<1x32x64xf32>
    tpu.vector_store %arg7[%c2_105, %c0_106, %c0_107], %308 {strides = array<i32>} : memref<3x32x64xf32, #tpu.memory_space<vmem>>, vector<1x32x64xf32>,
    return
  }
  func.func @transform_0(%arg0: i32) -> (i32, i32, i32) {
    %c0_i32 = arith.constant 0 : i32
    %c0_i32_0 = arith.constant 0 : i32
    %c0_i32_1 = arith.constant 0 : i32
    return %c0_i32, %arg0, %c0_i32_0 : i32, i32, i32
  }
  func.func @transform_1(%arg0: i32) -> (i32, i32, i32) {
    %c4_i32 = arith.constant 4 : i32
    %0 = arith.muli %arg0, %c4_i32 : i32
    %c1_i32 = arith.constant 1 : i32
    %1 = arith.subi %0, %c1_i32 : i32
    %c0_i32 = arith.constant 0 : i32
    %2 = arith.maxsi %1, %c0_i32 : i32
    %c0_i32_0 = arith.constant 0 : i32
    %c0_i32_1 = arith.constant 0 : i32
    %c0_i32_2 = arith.constant 0 : i32
    return %c0_i32_0, %2, %c0_i32_1 : i32, i32, i32
  }
  func.func @transform_2(%arg0: i32) -> (i32, i32) {
    %c0_i32 = arith.constant 0 : i32
    %c0_i32_0 = arith.constant 0 : i32
    %c0_i32_1 = arith.constant 0 : i32
    return %c0_i32, %c0_i32_0 : i32, i32
  }
  func.func @transform_3(%arg0: i32) -> (i32, i32) {
    %c0_i32 = arith.constant 0 : i32
    %c0_i32_0 = arith.constant 0 : i32
    %c0_i32_1 = arith.constant 0 : i32
    return %c0_i32, %c0_i32_0 : i32, i32
  }
  func.func @transform_4(%arg0: i32) -> (i32, i32) {
    %c0_i32 = arith.constant 0 : i32
    %c0_i32_0 = arith.constant 0 : i32
    %c0_i32_1 = arith.constant 0 : i32
    return %c0_i32, %c0_i32_0 : i32, i32
  }
  func.func @transform_5(%arg0: i32) -> (i32, i32) {
    %c0_i32 = arith.constant 0 : i32
    %c0_i32_0 = arith.constant 0 : i32
    %c0_i32_1 = arith.constant 0 : i32
    return %c0_i32, %c0_i32_0 : i32, i32
  }
  func.func @transform_6(%arg0: i32) -> (i32, i32, i32) {
    %c0_i32 = arith.constant 0 : i32
    %c0_i32_0 = arith.constant 0 : i32
    %c0_i32_1 = arith.constant 0 : i32
    return %c0_i32, %arg0, %c0_i32_0 : i32, i32, i32
  }
}

</mosaic_0001>

<bundles_post_ra>
// kernel: tpu_custom_call.1
= control target key start
LH: loop header
LB: loop body
LE: loop exit
PB: predicated region body
PF: predicated region fallthrough
CT: control target
= control target key end

     0   :  { %s4430_s0 = inlined_call_operand.hbm [shape: f32[3,64,64], index: 0, kind: input, shape index: {}]   ;;  %s4431_s1 = inlined_call_operand.hbm [shape: f32[3,64,64], index: 1, kind: input, shape index: {}]   ;;  %s4432_s2 = inlined_call_operand.vmem [shape: f32[2,32], index: 2, kind: input, shape index: {}]   ;;  %s4433_s3 = inlined_call_operand.vmem [shape: f32[64,4], index: 3, kind: input, shape index: {}]   ;;  %s4434_s4 = inlined_call_operand.vmem [shape: f32[32,2], index: 4, kind: input, shape index: {}]   ;;  %s4435_s5 = inlined_call_operand.vmem [shape: f32[4,64], index: 5, kind: input, shape index: {}]   ;;  %s4436_s6 = inlined_call_operand.hbm [shape: f32[3,64,64], index: 6, kind: output, shape index: {}]  }
   0x1   :  { %4448 = sst [smem:[#allocation23_spill]] %s4430_s0 }
   0x2   :  { %4449 = sst [smem:[#allocation24_spill]] %s4436_s6 }
   0x3   :  { %11 = vsyncpa [#allocation3], 0 }
   0x4   :  { %13 = vsyncpa [#allocation3 + $0x1], 0 }
   0x5   :  { %14 = vsyncpa [#allocation6], 0 }
   0x6   :  { %16 = vsyncpa [#allocation6 + $0x1], 0 }
   0x7   :  { %17 = vsyncpa [#allocation4], 0 }
   0x8   :  { %19 = vsyncpa [#allocation4 + $0x1], 0  ;;  %s3578_s21 = smov 0   ;;  %s3580_s22 = smov 0  }
   0x9   :  { %s3582_s23 = smov 0   ;;  %s3584_s24 = smov 0  }
   0xa   :  { %s3586_s25 = smov 0   ;;  %s3588_s26 = smov 0  }
   0xb   :  { %s3590_s27 = smov 0  }
   0xc LB: > { %4450 = sst [smem:[#allocation16_spill]] %s3508_s24  ;;  %s3614_s28 = sadd.s32 4294967295, %s3520_s27   ;;  %s3520_s27 = sphi %s3590_s27, %s4499_s27   ;;  %s3516_s26 = sphi %s3588_s26, %s4508_s26   ;;  %s3512_s25 = sphi %s3586_s25, %s4507_s25   ;;  %s3508_s24 = sphi %s3584_s24, %s4506_s24   ;;  %s3504_s23 = sphi %s3582_s23, %s4505_s23   ;;  %s3500_s22 = sphi %s3580_s22, %s4504_s22   ;;  %s3496_s21 = sphi %s3578_s21, %s4503_s21  }
   0xd   : > { %4451 = sst [smem:[#allocation17_spill]] %s3516_s26  ;;  %s2656_s29 = sadd.s32 4294967294, %s3520_s27  }
   0xe   : > { %s3618_s30 = sadd.s32 1, %s3520_s27   ;;  %s32_s7 = sadd.s32 1, %s3516_s26 }
   0xf   : > { %4452 = sst [smem:[#allocation18_spill]] %s3618_s30  ;;  %s29_s8 = ssub.s32 %s3520_s27, %s3618_s30 }
  0x10   : > { %p39_p0 = scmp.ne.s32.totalorder %s3516_s26, %s3512_s25  ;;  %p30_p1 = scmp.eq.s32.totalorder %s29_s8, 0 }
  0x11   : > { %p40_p2 = scmp.eq.s32.totalorder %s3520_s27, 0  ;;  %p4437_p3 = scmp.ne.s32.totalorder %s3512_s25, %s3508_s24 }
  0x12   : > { %p46_p4 = scmp.eq.s32.totalorder %s3614_s28, 0  ;;  %s2657_s12 = sshll.u32 %s3520_s27, 2 }
  0x13   : > { %s3630_s9 = scalar_select %p30_p1, %s3516_s26, %s32_s7  }
  0x14   : > { %p3637_p5 = por %p40_p2, %p39_p0  ;;  %p3646_p6 = por %p46_p4, %p4437_p3 }
  0x15   : > { %4453 = sst [smem:[#allocation19_spill]] %s3630_s9  ;;  %s66_s13 = sadd.s32 1, %s3504_s23 }
  0x16   : > { %s2658_s14 = sadd.s32 4294967295, %s2657_s12  ;;  %s2821_s15 = sadd.s32 4, %s2657_s12 }
  0x17   : > { %p57_p7 = scmp.gt.s32.totalorder %s2658_s14, 0  ;;  %s2660_s16 = sadd.s32 4294967295, %s2821_s15 }
  0x18   : > { %p61_p8 = scmp.gt.s32.totalorder %s2660_s16, 0  ;;  %p73_p9 = scmp.ne.s32.totalorder %s3504_s23, %s3500_s22 }
  0x19   : > { %s4510_s14 = smov (!%p57_p7, %s2658_s14), 0  ;;  %p79_p11 = scmp.ne.s32.totalorder %s3500_s22, %s3496_s21 }
  0x1a   : > { %s4512_s16 = smov (!%p61_p8, %s2660_s16), 0  ;;  %p3658_p10 = por %p73_p9, %p40_p2 }
  0x1b   : > { %s63_s18 = ssub.s32 %s4510_s14, %s4512_s16  ;;  %p187_p12 = scmp.eq.s32.totalorder %s3614_s28, 1 }
  0x1c   : > { %p64_p13 = scmp.eq.s32.totalorder %s63_s18, 0  ;;  %p3668_p1 = por %p79_p11, %p46_p4 }
  0x1d   : > { %p3675_p3 = por %p187_p12, %p39_p0  ;;  %p193_p7 = scmp.eq.s32.totalorder %s2656_s29, 1 }
  0x1e   : > { %s4457_s19 = scalar_select %p3668_p1, 1, 0 }
  0x1f   : > { %s4458_s20 = scalar_select %p3675_p3, 1, 0 }
  0x20   : > { %s3680_s7 = scalar_select %p64_p13, %s3504_s23, %s66_s13  }
  0x21   : > { %4459 = sst [smem:[#allocation20_spill]] %s4458_s20  ;;  %p4461_p2 = scmp.ne.s32.totalorder %s3512_s25, %s3508_s24 }
  0x22   : > { %4460 = sst [smem:[#allocation21_spill]] %s3680_s7  ;;  %p4445_p9 = scmp.ge.s32.totalorder %s3520_s27, 2 }
  0x23   : > { %p3685_p8 = por %p193_p7, %p4461_p2 }
  0x24   : > { %221 = sbr.rel (%p4445_p9) target bundleno = 84 (0x54), region = 32 }
  0x25   : > { %s4462_s8 = scalar_select %p3685_p8, 1, 0 }
  0x27   : > { %4463 = sst [smem:[#allocation22_spill]] %s4462_s8 }
  0x2b   : > { %s225_s21 = sand.u32 1, %s3516_s26   ;;  %s2822_s12 = sshll.u32 %s3520_s27, 9 }
  0x2c   : > { %s3310_s29 = smul.u32 96, %s225_s21  ;;  %s3522_s13 = smov 1024  }
  0x2d   : > { %3325 = sst [smem:[#allocation9]] (%p3637_p5), %s3522_s13  ;;  %s3523_s24 = smov 512  }
  0x2e   : > { %s3324_s15 = scalar_select %p3637_p5, [#allocation0], [#allocation12] }
  0x2f   : > { %s4464_s0 = sld [smem:[#allocation23_spill]]  ;;  %s229_s30 = scalar_lea.vmem [#allocation2], %s3310_s29 }
  0x30   : > { %s240_s7 = sld [smem:[%s3324_s15]]   ;;  %s248_s8 = sshll.u32 %s229_s30, 4  ;;  %s249_s8 = int_to_ptr.vmem [resolvable:$true] %s248_s8 }
  0x31   : > { %3326 = sst [smem:[#allocation9 + $0x1]] (%p3637_p5), %s3523_s24  ;;  %s3524_s26 = smov 4  }
  0x32   : > { %3327 = sst [smem:[#allocation9 + $0x2]] (%p3637_p5), %s3524_s26  ;;  %s3525_s6 = smov 128  }
  0x33   : > { %3328 = sst [smem:[#allocation9 + $0x3]] (%p3637_p5), %s3525_s6  ;;  %s3526_s13 = smov 8  }
  0x34   : > { %3329 = sst [smem:[#allocation9 + $0x4]] (%p3637_p5), %s3525_s6  ;;  %s226_s29 = scalar_lea.sflag [#allocation3], %s225_s21 }
  0x35   : > { %s235_s9 = scalar_lea.hbm %s4464_s0, %s2822_s12  ;;  %3330 = sst [smem:[#allocation9 + $0x5]] (%p3637_p5), %s3526_s13 }
  0x36   : > { %s2665_s12 = sshll.u32 %s240_s7, 26  ;;  %s3527_s16 = smov [#allocation8]  }
  0x37   : > { %s2666_s15 = sadd.s32 134217728, %s2665_s12  ;;  %s271_s24 = sand.u32 1, %s3504_s23  }
  0x38   : > { %3331 = dma.general (%p3637_p5), %s235_s9, 1536, %s249_s8, %s226_s29, %s3527_s16, [#allocation9], %s2666_s15, 0  }
  0x39   : > { %s2669_s26 = sshll.u32 %s4510_s14, 7  ;;  %s3311_s30 = smul.u32 24, %s271_s24 }
  0x3a   : > { %s3718_s20 = scalar_lea.hbm %s4431_s1, %s2669_s26  ;;  %s3722_s9 = scalar_lea.sflag [#allocation6], %s271_s24 }
  0x3b   : > { %s275_s6 = scalar_lea.vmem [#allocation5], %s3311_s30  ;;  %s3426_s10 = scalar_lea.hbm %s3718_s20, 384 }
  0x3c   : > { %s285_s7 = sshll.u32 %s275_s6, 4  ;;  %p3427_p0 = scmp.ne.s32.totalorder %s3718_s20, %s3426_s10  ;;  %s3720_s7 = int_to_ptr.vmem [resolvable:$true] %s285_s7 }
  0x3d   : > { %s3430_s0 = scalar_lea.hbm %s4431_s1, 3072  ;;  %p3431_p11 = scmp.lt.u32.totalorder %s3718_s20, %s4431_s1 }
  0x3e   : > { %p3428_p4 = pnand %p3427_p0, %p3658_p10  ;;  %p3432_p12 = scmp.lt.u32.totalorder %s3430_s0, %s3426_s10 }
  0x3f   : > { %p3434_p7 = scmp.lt.u32.totalorder %s3426_s10, %s3718_s20 }
  0x40   : > { %p3429_p5 = pneg %p3428_p4  ;;  %p3433_p13 = por %p3432_p12, %p3431_p11 }
  0x42   : > { %p3435_p2 = por %p3434_p7, %p3433_p13 }
  0x44   : > { %p3436_p9 = pnand %p3435_p2, %p3429_p5 }
  0x46   : > { %3439 = shalt.err (!%p3436_p9)
}
  0x47   : > { %s3440_s12 = scalar_lea.vmem %s3720_s7, 384  ;;  %s3528_s15 = smov [#allocation5]  }
  0x48   : > { %p3441_p0 = scmp.ne.s32.totalorder %s3720_s7, %s3440_s12  ;;  %s3444_s29 = sshll.u32 %s3528_s15, 4  ;;  %s3445_s29 = int_to_ptr.vmem [resolvable:$false] %s3444_s29 }
  0x49   : > { %s3446_s16 = scalar_lea.vmem %s3445_s29, 768  ;;  %p3447_p3 = scmp.lt.s32.totalorder %s3720_s7, %s3445_s29 }
  0x4a   : > { %p3442_p4 = pnand %p3441_p0, %p3658_p10  ;;  %p3448_p1 = scmp.lt.s32.totalorder %s3446_s16, %s3440_s12 }
  0x4c   : > { %p3443_p8 = pneg %p3442_p4  ;;  %p3449_p11 = por %p3448_p1, %p3447_p3 }
  0x4e   : > { %p3450_p12 = pnand %p3449_p11, %p3443_p8 }
  0x50   : > { %3453 = shalt.err (!%p3450_p12)
}
  0x51   : > { %s3529_s24 = smov 1024   ;;  %s3530_s26 = smov 128  }
  0x52   : > { %s3531_s30 = smov 8  }
  0x53   : > { %3332 = dma.hbm_to_vmem [thread:$0]  (%p3658_p10), %s3718_s20, 384, %s3720_s7, %s3722_s9, %s3529_s24, %s3530_s26, %s3531_s30  }
  0x54 PF: > { %p2670_p9 = scmp.ge.s32.totalorder %s3520_s27, 1  ;;  %p293_p5 = scmp.lt.s32.totalorder %s3520_s27, 3 }
  0x56   : > { %p294_p13 = pnand %p2670_p9, %p293_p5 }
  0x57   : > { %s3749_s18 = sand.u32 (!%p294_p13), 1, %s3512_s25  }
  0x58   : > { %297 = sbr.rel (%p294_p13) target bundleno = 1526 (0x5f6), region = 44  ;;  %s300_s10 = scalar_lea.sflag (!%p294_p13), [#allocation3], %s3749_s18 }
  0x59   : > { %s3312_s6 = smul.u32 (!%p294_p13), 96, %s3749_s18 }
  0x5b   : > { %s3755_s14 = scalar_lea.vmem (!%p294_p13), [#allocation2], %s3312_s6 }
  0x5f   : > { %3483 = dma.done.wait (%p3646_p6), %s300_s10, 1536  }
  0x60   : > { %3485 = vsyncadd (%p3646_p6), %s300_s10, 4294965760  ;;  %s308_s17 = sand.u32 1, %s3500_s22   ;;  %p4465_p3 = scmp.ne.s32.totalorder %s4457_s19, 0 }
  0x61   : > { %s3313_s20 = smul.u32 24, %s308_s17  ;;  %s309_s7 = scalar_lea.sflag [#allocation6], %s308_s17 }
  0x63   : > { %s3762_s9 = scalar_lea.vmem [#allocation5], %s3313_s20 }
  0x64   : > { %3487 = dma.done.wait (%p4465_p3), %s309_s7, 384  }
  0x65   : > { %3489 = vsyncadd (%p4465_p3), %s309_s7, 4294966912  ;;  %v3532_v0 = vmov 0.0|0.0   ;;  %vm3533_vm0 = vmmov 0   ;;  %v3534_v1 = vmov 0.0   ;;  %v352_v2 = vld [vmem:[%s3755_s14] sm:$0xff]  ;;  %v353_v3 = vld [vmem:[%s3755_s14 + $0x8] sm:$0xff]  ;;  %v367_v5 = vlaneseq }
  0x66   : > { %3174 = vmatprep.subr.bf16.mxu0 %v3532_v0  ;;  %3180 = vmatprep.subr.bf16.mxu1 %v3532_v0  ;;  %v3777_v4 = vld [vmem:[%s3755_s14 + $0x20] sm:$0xff]  ;;  %v3780_v6 = vld [vmem:[%s3755_s14 + $0x28] sm:$0xff]  ;;  %v354_v11 = vld [vmem:[%s3755_s14 + $0x10] sm:$0xff]  ;;  %s2679_s11 = sshll.u32 %s3614_s28, 5  ;;  %v3832_v54 = vpack.c.bf16 %v353_v3, %v352_v2  ;;  %v3535_v58 = vmov 1.0|1.0  }
  0x67   : > { %2945 = vmatprep.mubr.msk.f32.mxu0 %vm3533_vm0, %v3534_v1  ;;  %2956 = vmatprep.mubr.msk.f32.mxu1 %vm3533_vm0, %v3534_v1  ;;  %v3783_v7 = vld [vmem:[%s3755_s14 + $0x40] sm:$0xff]  ;;  %v3786_v8 = vld [vmem:[%s3755_s14 + $0x48] sm:$0xff]  ;;  %v381_v9 = vadd.f32 %v3777_v4, %v352_v2  ;;  %v382_v10 = vadd.f32 %v3780_v6, %v353_v3  ;;  %v355_v12 = vld [vmem:[%s3755_s14 + $0x18] sm:$0xff]  ;;  %v3806_v19 = vshrl.u32 %v367_v5, 7  ;;  %v372_v29 = vstv %s2679_s11  ;;  %p423_p6 = scmp.gt.s32.totalorder %s3614_s28, 0  ;;  %s4341_s26 = scalar_lea.vmem [#allocation7], %s3312_s6 }
  0x68   : > { %v3793_v13 = vld [vmem:[%s3755_s14 + $0x30] sm:$0xff]  ;;  %v3797_v15 = vld [vmem:[%s3755_s14 + $0x38] sm:$0xff]  ;;  %v3859_v59 = vpack.c.bf16 %v355_v12, %v354_v11  ;;  %v3878_v61 = vld [vmem:[%s4432_s2] sm:$0x3]  ;;  %vm469_vm15 = vcmask 261120   ;;  %v3882_v62 = vpack.c.bf16 %v3780_v6, %v3777_v4  ;;  %v3886_v63 = vpack.c.bf16 %v3786_v8, %v3783_v7  ;;  %s2518_s6 = scalar_lea.sflag [#allocation4], %s3749_s18 }
  0x69   : > { %v385_v14 = vadd.f32 %v3783_v7, %v381_v9  ;;  %v3800_v16 = vld [vmem:[%s3755_s14 + $0x50] sm:$0xff]  ;;  %v3803_v17 = vld [vmem:[%s3755_s14 + $0x58] sm:$0xff]  ;;  %v383_v18 = vadd.f32 %v3793_v13, %v354_v11  ;;  %v386_v20 = vadd.f32 %v3786_v8, %v382_v10  ;;  %v384_v21 = vadd.f32 %v3797_v15, %v355_v12  ;;  %v1843_v10 = vld [vmem:[%s4433_s3 + $0x8] sm:$0xff]  ;;  %s457_s19 = scalar_select %p423_p6, 1, 0 }
  0x6a   : > { %v369_v28 = vadd.s32 8, %v3806_v19  ;;  %v370_v35 = vadd.s32 16, %v3806_v19  ;;  %v3816_v37 = vadd.s32 %v372_v29, %v3806_v19  ;;  %v371_v39 = vadd.s32 24, %v3806_v19  ;;  %v1844_v12 = vld [vmem:[%s4433_s3 + $0x10] sm:$0xff] }
  0x6b   : > { %v390_v22 = vmul.f32 0.33333334, %v385_v14  ;;  %v387_v23 = vadd.f32 %v3800_v16, %v383_v18  ;;  %v391_v24 = vmul.f32 0.33333334, %v386_v20  ;;  %v388_v25 = vadd.f32 %v3803_v17, %v384_v21  ;;  %v1848_v18 = vld [vmem:[%s4433_s3 + $0x30] sm:$0xff]  ;;  %v1849_v20 = vld [vmem:[%s4433_s3 + $0x38] sm:$0xff] }
  0x6c   : > { %v3819_v41 = vadd.s32 %v372_v29, %v369_v28  ;;  %v3821_v47 = vadd.s32 %v372_v29, %v370_v35  ;;  %vm377_vm1 = vcmp.lt.s32.totalorder %v3816_v37, 64  ;;  %v3826_v50 = vadd.s32 %v372_v29, %v371_v39 }
  0x6d   : > { %v395_v26 = vmul.f32 0.00390625, %v390_v22  ;;  %v392_v27 = vmul.f32 0.33333334, %v387_v23  ;;  %v396_v30 = vmul.f32 0.00390625, %v391_v24  ;;  %v393_v31 = vmul.f32 0.33333334, %v388_v25 }
  0x6e   : > { %vm378_vm2 = vcmp.lt.s32.totalorder %v3819_v41, 64  ;;  %vm379_vm6 = vcmp.lt.s32.totalorder %v3821_v47, 64  ;;  %vm380_vm8 = vcmp.lt.s32.totalorder %v3826_v50, 64  ;;  %v3904_v2 = vpack.c.bf16 %v3797_v15, %v3793_v13  ;;  %v1845_v13 = vld [vmem:[%s4433_s3 + $0x18] sm:$0xff]  ;;  %v1846_v15 = vld [vmem:[%s4433_s3 + $0x20] sm:$0xff] }
  0x6f   : > { %v399_v32 = vmul.f32 4.0, %v395_v26  ;;  %v397_v33 = vmul.f32 0.00390625, %v392_v27  ;;  %v400_v34 = vmul.f32 4.0, %v396_v30  ;;  %v398_v36 = vmul.f32 0.00390625, %v393_v31  ;;  %v4156_v22 = vld [vmem:[%s3762_s9 + $0x7] sm:$0x1] }
  0x70   : > { %v3908_v3 = vpack.c.bf16 %v3803_v17, %v3800_v16  ;;  %v3298_v14 = vpack.c.bf16 %v1845_v13, %v1844_v12  ;;  %v1847_v16 = vld [vmem:[%s4433_s3 + $0x28] sm:$0xff]  ;;  %v3306_v21 = vpack.c.bf16 %v1849_v20, %v1848_v18 }
  0x71   : > { %v403_v38 = vfloor.f32 %v399_v32  ;;  %v401_v40 = vmul.f32 4.0, %v397_v33  ;;  %v404_v42 = vfloor.f32 %v400_v34  ;;  %v402_v43 = vmul.f32 4.0, %v398_v36  ;;  %v4159_v23 = vld [vmem:[%s3762_s9 + $0xf] sm:$0x1]  ;;  %v4164_v25 = vld [vmem:[%s3762_s9 + $0x17] sm:$0x1] }
  0x72   : > { %v3302_v17 = vpack.c.bf16 %v1847_v16, %v1846_v15  ;;  %v416_v24 = vadd.f32 %v4159_v23, %v4156_v22  ;;  %v458_v33 = vstv %s457_s19  ;;  %v4182_v36 = vsub.s32 0, %v3806_v19 }
  0x73   : > { %v3314_v44 = vtrunc.f32 %v403_v38  ;;  %v405_v45 = vfloor.f32 %v401_v40  ;;  %v3316_v46 = vtrunc.f32 %v404_v42  ;;  %v406_v48 = vfloor.f32 %v402_v43 }
  0x74   : > { %v417_v26 = vadd.f32 %v4164_v25, %v416_v24 }
  0x75   : > { %v3824_v49 = vcvt.f32.s32 %v3314_v44  ;;  %v3318_v51 = vtrunc.f32 %v405_v45  ;;  %v3829_v52 = vcvt.f32.s32 %v3316_v46  ;;  %v3320_v53 = vtrunc.f32 %v406_v48 }
  0x76   : > { %v418_v27 = vmul.f32 0.33333334, %v417_v26 }
  0x77   : > { %vm428_vm3 = vcmp.eq.s32.totalorder %v3824_v49, 0  ;;  %v3834_v55 = vcvt.f32.s32 %v3318_v51  ;;  %vm429_vm4 = vcmp.eq.s32.totalorder %v3829_v52, 0  ;;  %v3840_v56 = vcvt.f32.s32 %v3320_v53 }
  0x78   : > { %vm432_vm5 = vmand %vm428_vm3, %vm377_vm1  ;;  %vm774_vm3 = vcmp.eq.s32.totalorder %v3824_v49, 1  ;;  %v419_v28 = vmul.f32 0.00390625, %v418_v27 }
  0x79   : > { %vm433_vm7 = vmand %vm429_vm4, %vm378_vm2  ;;  %vm430_vm9 = vcmp.eq.s32.totalorder %v3834_v55, 0  ;;  %vm431_vm11 = vcmp.eq.s32.totalorder %v3840_v56, 0  ;;  %vm775_vm4 = vcmp.eq.s32.totalorder %v3829_v52, 1 }
  0x7a   : > { %vm3846_vm10 = vmpackc.low %vm433_vm7, %vm432_vm5  ;;  %v420_v29 = vmul.f32 4.0, %v419_v28 }
  0x7b   : > { %3176 = vmatpush3.bf16.msk.msra.mxu0 %vm3846_vm10, %v3535_v58  ;;  %3183 = vmatpush3.bf16.msk.msra.mxu1 %vm3846_vm10, %v3832_v54  ;;  %vm434_vm12 = vmand %vm430_vm9, %vm379_vm6  ;;  %vm776_vm9 = vcmp.eq.s32.totalorder %v3834_v55, 1 }
  0x7c   : > { %3177 = vmatprep.subr.bf16.mxu0 %v3532_v0  ;;  %3184 = vmatprep.subr.bf16.mxu1 %v3532_v0  ;;  %vm435_vm13 = vmand %vm431_vm11, %vm380_vm8  ;;  %v421_v30 = vfloor.f32 %v420_v29 }
  0x7d   : > { %vm3865_vm14 = vmpackc.low %vm435_vm13, %vm434_vm12 }
  0x7e   : > { %vm778_vm5 = vmand %vm774_vm3, %vm377_vm1  ;;  %vm1113_vm3 = vcmp.eq.s32.totalorder %v3824_v49, 2  ;;  %v3322_v31 = vtrunc.f32 %v421_v30 }
  0x7f   : > { %3179 = vmatpush3.bf16.msk.msra.mxu0 %vm3865_vm14, %v3535_v58  ;;  %3187 = vmatpush3.bf16.msk.msra.mxu1 %vm3865_vm14, %v3859_v59  ;;  %vm779_vm7 = vmand %vm775_vm4, %vm378_vm2  ;;  %vm1114_vm4 = vcmp.eq.s32.totalorder %v3829_v52, 2 }
  0x80   : > { %3188 = vmatprep.subr.bf16.mxu0 %v3532_v0  ;;  %3196 = vmatprep.subr.bf16.mxu1 %v3532_v0  ;;  %vm3928_vm11 = vmpackc.low %vm779_vm7, %vm778_vm5  ;;  %v4168_v32 = vcvt.f32.s32 %v3322_v31 }
  0x81   : > { %vm780_vm12 = vmand %vm776_vm9, %vm379_vm6  ;;  %vm1115_vm9 = vcmp.eq.s32.totalorder %v3834_v55, 2 }
  0x82   : > { %2946 = vmatmul.mubr.msk.f32.vlgmr.msra.gmra.mrb[0].mxu0 %vm469_vm15, %v3878_v61  ;;  %2957 = vmatmul.mubr.msk.f32.vlgmr.msra.gmra.mrb[0].mxu1 %vm469_vm15, %v3878_v61  ;;  %vm1117_vm5 = vmand %vm1113_vm3, %vm377_vm1  ;;  %vm1452_vm3 = vcmp.eq.s32.totalorder %v3824_v49, 3 }
  0x83   : > { %3191 = vmatpush3.bf16.msk.msra.mxu0 %vm3846_vm10, %v3882_v62  ;;  %3199 = vmatpush3.bf16.msk.msra.mxu1 %vm3846_vm10, %v3886_v63  ;;  %vm777_vm10 = vcmp.eq.s32.totalorder %v3840_v56, 1  ;;  %vm1118_vm7 = vmand %vm1114_vm4, %vm378_vm2  ;;  %vm1453_vm4 = vcmp.eq.s32.totalorder %v3829_v52, 3 }
  0x84   : > { %3192 = vmatprep.subr.bf16.mxu0 %v3532_v0  ;;  %3200 = vmatprep.subr.bf16.mxu1 %v3532_v0  ;;  %vm781_vm13 = vmand %vm777_vm10, %vm380_vm8  ;;  %vm1116_vm10 = vcmp.eq.s32.totalorder %v3840_v56, 2 }
  0x85   : > { %2967 = vmatprep.mubr.msk.f32.mxu0 %vm3533_vm0, %v3534_v1  ;;  %2978 = vmatprep.mubr.msk.f32.mxu1 %vm3533_vm0, %v3534_v1 }
  0x87   : > { %3195 = vmatpush3.bf16.msk.msra.mxu0 %vm3865_vm14, %v3904_v2  ;;  %3203 = vmatpush3.bf16.msk.msra.mxu1 %vm3865_vm14, %v3908_v3  ;;  %vm3950_vm14 = vmpackc.low %vm781_vm13, %vm780_vm12 }
  0x88   : > { %3204 = vmatprep.subr.bf16.mxu0 %v3532_v0  ;;  %3210 = vmatprep.subr.bf16.mxu1 %v3532_v0  ;;  %vm1119_vm12 = vmand %vm1115_vm9, %vm379_vm6  ;;  %vm1454_vm9 = vcmp.eq.s32.totalorder %v3834_v55, 3 }
  0x89   : > { %vm1120_vm13 = vmand %vm1116_vm10, %vm380_vm8  ;;  %vm1455_vm10 = vcmp.eq.s32.totalorder %v3840_v56, 3 }
  0x8a   : > { %2968 = vmatmul.mubr.msk.f32.vlgmr.msra.gmra.mrb[2].mxu0 %vm469_vm15, %v3878_v61  ;;  %2979 = vmatmul.mubr.msk.f32.vlgmr.msra.gmra.mrb[2].mxu1 %vm469_vm15, %v3878_v61 }
  0x8b   : > { %3206 = vmatpush3.bf16.msk.msra.mxu0 %vm3928_vm11, %v3535_v58  ;;  %3213 = vmatpush3.bf16.msk.msra.mxu1 %vm3928_vm11, %v3832_v54 }
  0x8c   : > { %3207 = vmatprep.subr.bf16.mxu0 %v3532_v0  ;;  %3214 = vmatprep.subr.bf16.mxu1 %v3532_v0 }
  0x8d   : > { %2989 = vmatprep.mubr.msk.f32.mxu0 %vm3533_vm0, %v3534_v1  ;;  %3000 = vmatprep.mubr.msk.f32.mxu1 %vm3533_vm0, %v3534_v1 }
  0x8f   : > { %3209 = vmatpush3.bf16.msk.msra.mxu0 %vm3950_vm14, %v3535_v58  ;;  %3217 = vmatpush3.bf16.msk.msra.mxu1 %vm3950_vm14, %v3859_v59 }
  0x90   : > { %3218 = vmatprep.subr.bf16.mxu0 %v3532_v0  ;;  %3226 = vmatprep.subr.bf16.mxu1 %v3532_v0 }
  0x92   : > { %2990 = vmatmul.mubr.msk.f32.vlgmr.msra.gmra.mrb[4].mxu0 %vm469_vm15, %v3878_v61  ;;  %3001 = vmatmul.mubr.msk.f32.vlgmr.msra.gmra.mrb[4].mxu1 %vm469_vm15, %v3878_v61 }
  0x93   : > { %3221 = vmatpush3.bf16.msk.msra.mxu0 %vm3928_vm11, %v3882_v62  ;;  %3229 = vmatpush3.bf16.msk.msra.mxu1 %vm3928_vm11, %v3886_v63  ;;  %vm3996_vm11 = vmpackc.low %vm1118_vm7, %vm1117_vm5 }
  0x94   : > { %3222 = vmatprep.subr.bf16.mxu0 %v3532_v0  ;;  %3230 = vmatprep.subr.bf16.mxu1 %v3532_v0  ;;  %vm1456_vm5 = vmand %vm1452_vm3, %vm377_vm1  ;;  %vm1827_vm3 = vcmask 1041408  }
  0x95   : > { %3011 = vmatprep.mubr.msk.f32.mxu0 %vm3533_vm0, %v3534_v1  ;;  %3022 = vmatprep.mubr.msk.f32.mxu1 %vm3533_vm0, %v3534_v1  ;;  %vm1457_vm7 = vmand %vm1453_vm4, %vm378_vm2 }
  0x96   : > { %vm4064_vm1 = vmpackc.low %vm1457_vm7, %vm1456_vm5  ;;  %vm1829_vm5 = vcmask 1043456   ;;  %vm1831_vm7 = vcmask 1045504  }
  0x97   : > { %3225 = vmatpush3.bf16.msk.msra.mxu0 %vm3950_vm14, %v3904_v2  ;;  %3233 = vmatpush3.bf16.msk.msra.mxu1 %vm3950_vm14, %v3908_v3  ;;  %vm4018_vm14 = vmpackc.low %vm1120_vm13, %vm1119_vm12  ;;  %vm424_vm13 = vcmp.eq.s32.totalorder %v3806_v19, 0 }
  0x98   : > { %3234 = vmatprep.subr.bf16.mxu0 %v3532_v0  ;;  %3240 = vmatprep.subr.bf16.mxu1 %v3532_v0  ;;  %vm1458_vm2 = vmand %vm1454_vm9, %vm379_vm6  ;;  %v4194_v41 = vsel %vm424_vm13, 1.0, %v3534_v1  ;;  %vm1850_vm9 = vcmask 523264   ;;  %vm2001_vm13 = vcmask 31744  }
  0x9a   : > { %3012 = vmatmul.mubr.msk.f32.vlgmr.msra.gmra.mrb[6].mxu0 %vm469_vm15, %v3878_v61  ;;  %3023 = vmatmul.mubr.msk.f32.vlgmr.msra.gmra.mrb[6].mxu1 %vm469_vm15, %v3878_v61 }
  0x9b   : > { %3236 = vmatpush3.bf16.msk.msra.mxu0 %vm3996_vm11, %v3535_v58  ;;  %3243 = vmatpush3.bf16.msk.msra.mxu1 %vm3996_vm11, %v3832_v54 }
  0x9c   : > { %3237 = vmatprep.subr.bf16.mxu0 %v3532_v0  ;;  %3244 = vmatprep.subr.bf16.mxu1 %v3532_v0 }
  0x9d   : > { %3033 = vmatprep.mubr.msk.f32.mxu0 %vm3533_vm0, %v3534_v1  ;;  %3044 = vmatprep.mubr.msk.f32.mxu1 %vm3533_vm0, %v3534_v1 }
  0x9f   : > { %3239 = vmatpush3.bf16.msk.msra.mxu0 %vm4018_vm14, %v3535_v58  ;;  %3247 = vmatpush3.bf16.msk.msra.mxu1 %vm4018_vm14, %v3859_v59 }
  0xa0   : > { %3248 = vmatprep.subr.bf16.mxu0 %v3532_v0  ;;  %3256 = vmatprep.subr.bf16.mxu1 %v3532_v0 }
  0xa2   : > { %3034 = vmatmul.mubr.msk.f32.vlgmr.msra.gmra.mrb[8].mxu0 %vm469_vm15, %v3878_v61  ;;  %3045 = vmatmul.mubr.msk.f32.vlgmr.msra.gmra.mrb[8].mxu1 %vm469_vm15, %v3878_v61 }
  0xa3   : > { %3251 = vmatpush3.bf16.msk.msra.mxu0 %vm3996_vm11, %v3882_v62  ;;  %3259 = vmatpush3.bf16.msk.msra.mxu1 %vm3996_vm11, %v3886_v63  ;;  %vm1459_vm11 = vmand %vm1455_vm10, %vm380_vm8  ;;  %vm456_vm8 = vcmp.eq.s32.totalorder %v4168_v32, 0  ;;  %vm1141_vm10 = vcmp.eq.s32.totalorder %v4168_v32, 2 }
  0xa4   : > { %3252 = vmatprep.subr.bf16.mxu0 %v3532_v0  ;;  %3260 = vmatprep.subr.bf16.mxu1 %v3532_v0  ;;  %vm4086_vm6 = vmpackc.low %vm1459_vm11, %vm1458_vm2  ;;  %vm1480_vm2 = vcmp.eq.s32.totalorder %v4168_v32, 3 }
  0xa5   : > { %3055 = vmatprep.mubr.msk.f32.mxu0 %vm3533_vm0, %v3534_v1  ;;  %3066 = vmatprep.mubr.msk.f32.mxu1 %vm3533_vm0, %v3534_v1 }
  0xa7   : > { %3255 = vmatpush3.bf16.msk.msra.mxu0 %vm4018_vm14, %v3904_v2  ;;  %3263 = vmatpush3.bf16.msk.msra.mxu1 %vm4018_vm14, %v3908_v3  ;;  %vm802_vm14 = vcmp.eq.s32.totalorder %v4168_v32, 1 }
  0xa8   : > { %3264 = vmatprep.subr.bf16.mxu0 %v3532_v0  ;;  %3270 = vmatprep.subr.bf16.mxu1 %v3532_v0 }
  0xaa   : > { %3056 = vmatmul.mubr.msk.f32.vlgmr.msra.gmra.mrb[10].mxu0 %vm469_vm15, %v3878_v61  ;;  %3067 = vmatmul.mubr.msk.f32.vlgmr.msra.gmra.mrb[10].mxu1 %vm469_vm15, %v3878_v61 }
  0xab   : > { %3266 = vmatpush3.bf16.msk.msra.mxu0 %vm4064_vm1, %v3535_v58  ;;  %3273 = vmatpush3.bf16.msk.msra.mxu1 %vm4064_vm1, %v3832_v54 }
  0xac   : > { %3267 = vmatprep.subr.bf16.mxu0 %v3532_v0  ;;  %3274 = vmatprep.subr.bf16.mxu1 %v3532_v0 }
  0xad   : > { %3077 = vmatprep.mubr.msk.f32.mxu0 %vm3533_vm0, %v3534_v1  ;;  %3088 = vmatprep.mubr.msk.f32.mxu1 %vm3533_vm0, %v3534_v1 }
  0xaf   : > { %3269 = vmatpush3.bf16.msk.msra.mxu0 %vm4086_vm6, %v3535_v58  ;;  %3277 = vmatpush3.bf16.msk.msra.mxu1 %vm4086_vm6, %v3859_v59 }
  0xb0   : > { %3278 = vmatprep.subr.bf16.mxu0 %v3532_v0  ;;  %3286 = vmatprep.subr.bf16.mxu1 %v3532_v0 }
  0xb2   : > { %3078 = vmatmul.mubr.msk.f32.vlgmr.msra.gmra.mrb[12].mxu0 %vm469_vm15, %v3878_v61  ;;  %3089 = vmatmul.mubr.msk.f32.vlgmr.msra.gmra.mrb[12].mxu1 %vm469_vm15, %v3878_v61 }
  0xb3   : > { %3281 = vmatpush3.bf16.msk.msra.mxu0 %vm4064_vm1, %v3882_v62  ;;  %3289 = vmatpush3.bf16.msk.msra.mxu1 %vm4064_vm1, %v3886_v63 }
  0xb4   : > { %3282 = vmatprep.subr.bf16.mxu0 %v3532_v0  ;;  %3290 = vmatprep.subr.bf16.mxu1 %v3532_v0  ;;  %v1842_v0 = vld [vmem:[%s4433_s3] sm:$0xff] }
  0xb5   : > { %3099 = vmatprep.mubr.msk.f32.mxu0 %vm3533_vm0, %v3534_v1  ;;  %3110 = vmatprep.mubr.msk.f32.mxu1 %vm3533_vm0, %v3534_v1  ;;  %v3294_v11 = vpack.c.bf16 %v1843_v10, %v1842_v0 }
  0xb7   : > { %3285 = vmatpush3.bf16.msk.msra.mxu0 %vm4086_vm6, %v3904_v2  ;;  %3293 = vmatpush3.bf16.msk.msra.mxu1 %vm4086_vm6, %v3908_v3 }
  0xb8   : > { %3135 = vmatprep.subr.mxu1 %v3534_v1  ;;  %3295 = vmatprep.subr.bf16.mxu0 %v3294_v11 }
  0xba   : > { %3100 = vmatmul.mubr.msk.f32.vlgmr.msra.gmra.mrb[14].mxu0 %vm469_vm15, %v3878_v61  ;;  %3111 = vmatmul.mubr.msk.f32.vlgmr.msra.gmra.mrb[14].mxu1 %vm469_vm15, %v3878_v61  ;;  %vm4171_vm15 = vcmp.eq.s32.totalorder %v458_v33, 1 }
  0xbb   : > { %3137 = vmatprep.mubr.msk.f32.mxu1 %vm3533_vm0, %v3534_v1  ;;  %3297 = vmatpush3.bf16.msra.mxu0 %v3294_v11  ;;  %vm4177_vm12 = vmand %vm456_vm8, %vm4171_vm15 }
  0xbc   : > { %3299 = vmatprep.subr.bf16.mxu0 %v3298_v14  ;;  %v2687_v37 = vsel %vm4177_vm12, 1.0, %v3534_v1  ;;  %v543_v38 = vsel %vm4177_vm12, %v4156_v22, 0.0  ;;  %v620_v44 = vsel %vm4177_vm12, %v4159_v23, 0.0  ;;  %v697_v45 = vsel %vm4177_vm12, %v4164_v25, 0.0  ;;  %vm4209_vm4 = vmand %vm802_vm14, %vm4171_vm15 }
  0xbd   : > { %v467_v39 = vrot.slane %v2687_v37, %v4182_v36  ;;  %v548_v40 = vrot.slane %v543_v38, %v4182_v36  ;;  %v625_v51 = vrot.slane %v620_v44, %v4182_v36  ;;  %v702_v52 = vrot.slane %v697_v45, %v4182_v36  ;;  %vm4240_vm1 = vmand %vm1141_vm10, %vm4171_vm15 }
  0xbe   : > { %v2712_v58 = vsel %vm4209_vm4, 1.0, %v3534_v1  ;;  %v882_v59 = vsel %vm4209_vm4, %v4156_v22, 0.0  ;;  %v959_v11 = vsel %vm4209_vm4, %v4159_v23, 0.0  ;;  %v1036_v12 = vsel %vm4209_vm4, %v4164_v25, 0.0  ;;  %vm4271_vm11 = vmand %vm1480_vm2, %vm4171_vm15 }
  0xbf   : > { %3301 = vmatpush3.bf16.msra.mxu0 %v3298_v14  ;;  %v468_v42 = vmul.f32 %v4194_v41, %v467_v39  ;;  %v549_v43 = vmul.f32 %v4194_v41, %v548_v40  ;;  %v626_v56 = vmul.f32 %v4194_v41, %v625_v51  ;;  %v703_v57 = vmul.f32 %v4194_v41, %v702_v52 }
  0xc0   : > { %3303 = vmatprep.subr.bf16.mxu0 %v3302_v17  ;;  %v810_v4 = vrot.slane %v2712_v58, %v4182_v36  ;;  %v887_v5 = vrot.slane %v882_v59, %v4182_v36  ;;  %v964_v20 = vrot.slane %v959_v11, %v4182_v36  ;;  %v2737_v30 = vsel %vm4240_vm1, 1.0, %v3534_v1 }
  0xc1   : > { %v1221_v31 = vsel %vm4240_vm1, %v4156_v22, 0.0  ;;  %vm2078_vm14 = vcmask 15360  }
  0xc2   : > { %v811_v9 = vmul.f32 %v4194_v41, %v810_v4  ;;  %v888_v0 = vmul.f32 %v4194_v41, %v887_v5  ;;  %v965_v28 = vmul.f32 %v4194_v41, %v964_v20 }
  0xc3   : > { %3305 = vmatpush3.bf16.msra.mxu0 %v3302_v17 }
  0xc4   : > { %3307 = vmatprep.subr.bf16.mxu0 %v3306_v21 }
  0xc7   : > { %3309 = vmatpush3.bf16.msra.mxu0 %v3306_v21  ;;  %v1041_v21 = vrot.slane %v1036_v12, %v4182_v36 }
  0xc9   : > { %v1042_v29 = vmul.f32 %v4194_v41, %v1041_v21 }
 0x155   : > { %v539_v19 = vpop.f32.mrb[0].mxu0  ;;  %v616_v46 = vpop.f32.mrb[0].mxu1 }
 0x156   : > { %v540_v47 = vadd.f32 %v539_v19, %v468_v42  ;;  %v617_v48 = vadd.f32 %v616_v46, %v549_v43  ;;  %v2947_v49 = vpop.f32.mrb[1].mxu0  ;;  %v2958_v50 = vpop.f32.mrb[1].mxu1  ;;  %v1149_v42 = vrot.slane %v2737_v30, %v4182_v36  ;;  %v1226_v43 = vrot.slane %v1221_v31, %v4182_v36 }
 0x157   : > { %v1298_v49 = vsel %vm4240_vm1, %v4159_v23, 0.0  ;;  %v1375_v50 = vsel %vm4240_vm1, %v4164_v25, 0.0 }
 0x158   : > { %v1792_v53 = vrot.slane %v617_v48, 6  ;;  %v1150_v46 = vmul.f32 %v4194_v41, %v1149_v42  ;;  %v1380_v58 = vrot.slane %v1375_v50, %v4182_v36 }
 0x15a   : > { %v1828_v55 = vsel %vm1827_vm3, %v540_v47, %v1792_v53  ;;  %v1227_v47 = vmul.f32 %v4194_v41, %v1226_v43  ;;  %v1381_v32 = vmul.f32 %v4194_v41, %v1380_v58 }
 0x15d   : > { %v693_v60 = vpop.f32.mrb[2].mxu0  ;;  %v770_v61 = vpop.f32.mrb[2].mxu1 }
 0x15e   : > { %v694_v62 = vadd.f32 %v693_v60, %v626_v56  ;;  %v2969_v63 = vpop.f32.mrb[3].mxu0  ;;  %v771_v2 = vadd.f32 %v770_v61, %v703_v57  ;;  %v2980_v3 = vpop.f32.mrb[3].mxu1  ;;  %v1303_v57 = vrot.slane %v1298_v49, %v4182_v36 }
 0x15f   : > { %v2762_v63 = vsel %vm4271_vm11, 1.0, %v3534_v1 }
 0x160   : > { %v1795_v6 = vrot.slane %v694_v62, 4  ;;  %v1798_v7 = vrot.slane %v771_v2, 2  ;;  %v1304_v62 = vmul.f32 %v4194_v41, %v1303_v57  ;;  %v1560_v2 = vsel %vm4271_vm11, %v4156_v22, 0.0 }
 0x162   : > { %v1830_v8 = vsel %vm1829_vm5, %v1828_v55, %v1795_v6 }
 0x163   : > { %v1832_v10 = vsel %vm1831_vm7, %v1830_v8, %v1798_v7  ;;  %v1488_v8 = vrot.slane %v2762_v63, %v4182_v36 }
 0x164   : > { %3129 = vmatprep.mubr.msk.f32.mxu0 %vm1850_vm9, %v1832_v10 }
 0x165   : > { %v878_v13 = vpop.f32.mrb[4].mxu0  ;;  %v955_v14 = vpop.f32.mrb[4].mxu1  ;;  %v1489_v12 = vmul.f32 %v4194_v41, %v1488_v8 }
 0x166   : > { %v879_v15 = vadd.f32 %v878_v13, %v811_v9  ;;  %v956_v16 = vadd.f32 %v955_v14, %v888_v0  ;;  %v2991_v17 = vpop.f32.mrb[5].mxu0  ;;  %v3002_v18 = vpop.f32.mrb[5].mxu1  ;;  %v1565_v9 = vrot.slane %v1560_v2, %v4182_v36  ;;  %v1637_v14 = vsel %vm4271_vm11, %v4159_v23, 0.0 }
 0x167   : > { %v1642_v26 = vrot.slane %v1637_v14, %v4182_v36  ;;  %v1998_v14 = vld [vmem:[%s4434_s4 + $0x18] sm:$0xff] }
 0x168   : > { %v1801_v24 = vrot.slane %v956_v16, 6  ;;  %v1566_v13 = vmul.f32 %v4194_v41, %v1565_v9 }
 0x169   : > { %v1643_v23 = vmul.f32 %v4194_v41, %v1642_v26 }
 0x16a   : > { %v1833_v27 = vsel %vm1827_vm3, %v879_v15, %v1801_v24  ;;  %v1714_v15 = vsel %vm4271_vm11, %v4164_v25, 0.0 }
 0x16d   : > { %v1032_v33 = vpop.f32.mrb[6].mxu0  ;;  %v1109_v35 = vpop.f32.mrb[6].mxu1 }
 0x16e   : > { %v1033_v37 = vadd.f32 %v1032_v33, %v965_v28  ;;  %v3013_v38 = vpop.f32.mrb[7].mxu0  ;;  %v1110_v39 = vadd.f32 %v1109_v35, %v1042_v29  ;;  %v3024_v40 = vpop.f32.mrb[7].mxu1 }
 0x170   : > { %v1804_v44 = vrot.slane %v1033_v37, 4  ;;  %v1807_v45 = vrot.slane %v1110_v39, 2 }
 0x172   : > { %v1834_v19 = vsel %vm1829_vm5, %v1833_v27, %v1804_v44  ;;  %v1719_v27 = vrot.slane %v1714_v15, %v4182_v36  ;;  %v4308_v36 = vld [vmem:[%s4435_s5] sm:$0xf] }
 0x173   : > { %v1835_v48 = vsel %vm1831_vm7, %v1834_v19, %v1807_v45  ;;  %3136 = vmatpush3.msk.msra.mxu1 %vm1829_vm5, %v4308_v36 }
 0x174   : > { %3130 = vmatmul.mubr.msk.f32.vlgmr.msra.gmra.mrb[16].mxu0 %vm1850_vm9, %v1835_v48  ;;  %v1720_v30 = vmul.f32 %v4194_v41, %v1719_v27 }
 0x175   : > { %v1217_v51 = vpop.f32.mrb[8].mxu0  ;;  %v1294_v52 = vpop.f32.mrb[8].mxu1 }
 0x176   : > { %v1218_v53 = vadd.f32 %v1217_v51, %v1150_v46  ;;  %v1295_v54 = vadd.f32 %v1294_v52, %v1227_v47  ;;  %v3035_v55 = vpop.f32.mrb[9].mxu0  ;;  %v3046_v56 = vpop.f32.mrb[9].mxu1 }
 0x178   : > { %v1810_v59 = vrot.slane %v1295_v54, 6 }
 0x17a   : > { %v1836_v61 = vsel %vm1827_vm3, %v1218_v53, %v1810_v59 }
 0x17d   : > { %v1371_v3 = vpop.f32.mrb[10].mxu0  ;;  %v1448_v34 = vpop.f32.mrb[10].mxu1 }
 0x17e   : > { %v1372_v4 = vadd.f32 %v1371_v3, %v1304_v62  ;;  %v3057_v5 = vpop.f32.mrb[11].mxu0  ;;  %v1449_v6 = vadd.f32 %v1448_v34, %v1381_v32  ;;  %v3068_v7 = vpop.f32.mrb[11].mxu1 }
 0x180   : > { %v1813_v0 = vrot.slane %v1372_v4, 4  ;;  %v1816_v10 = vrot.slane %v1449_v6, 2 }
 0x182   : > { %v1837_v11 = vsel %vm1829_vm5, %v1836_v61, %v1813_v0 }
 0x183   : > { %v1838_v22 = vsel %vm1831_vm7, %v1837_v11, %v1816_v10  ;;  %v1995_v10 = vld [vmem:[%s4434_s4] sm:$0xff] }
 0x184   : > { %3132 = vmatprep.mubr.msk.f32.mxu0 %vm1850_vm9, %v1838_v22  ;;  %v1997_v22 = vld [vmem:[%s4434_s4 + $0x10] sm:$0xff] }
 0x185   : > { %v1556_v16 = vpop.f32.mrb[12].mxu0  ;;  %v1633_v17 = vpop.f32.mrb[12].mxu1 }
 0x186   : > { %v1557_v18 = vadd.f32 %v1556_v16, %v1489_v12  ;;  %v1634_v20 = vadd.f32 %v1633_v17, %v1566_v13  ;;  %v3079_v21 = vpop.f32.mrb[13].mxu0  ;;  %v3090_v24 = vpop.f32.mrb[13].mxu1  ;;  %v1996_v12 = vld [vmem:[%s4434_s4 + $0x8] sm:$0xff] }
 0x188   : > { %v1819_v28 = vrot.slane %v1634_v20, 6 }
 0x18a   : > { %v1839_v29 = vsel %vm1827_vm3, %v1557_v18, %v1819_v28 }
 0x18d   : > { %v1710_v25 = vpop.f32.mrb[14].mxu0  ;;  %v1787_v31 = vpop.f32.mrb[14].mxu1 }
 0x18e   : > { %v1711_v33 = vadd.f32 %v1710_v25, %v1643_v23  ;;  %v1788_v35 = vadd.f32 %v1787_v31, %v1720_v30  ;;  %v3101_v37 = vpop.f32.mrb[15].mxu0  ;;  %v3112_v38 = vpop.f32.mrb[15].mxu1 }
 0x190   : > { %v1822_v39 = vrot.slane %v1711_v33, 4  ;;  %v1825_v40 = vrot.slane %v1788_v35, 2 }
 0x192   : > { %v1840_v42 = vsel %vm1829_vm5, %v1839_v29, %v1822_v39 }
 0x193   : > { %v1841_v43 = vsel %vm1831_vm7, %v1840_v42, %v1825_v40 }
 0x194   : > { %3133 = vmatmul.mubr.msk.f32.gmra.mrb[18].mxu0 %vm1850_vm9, %v1841_v43 }
 0x195   : > { %3168 = vmatprep.mubr.msk.f32.mxu0 %vm2078_vm14, %v1995_v10 }
 0x247   : > { %v3131_v41 = vpop.f32.mrb[16].mxu0 }
 0x248   : > { %v1950_v44 = vrot.slane %v3131_v41, 2  ;;  %v1956_v45 = vrot.slane %v3131_v41, 4  ;;  %v1961_v19 = vrot.slane %v3131_v41, 6  ;;  %v1929_v46 = vpop.f32.mrb[17].mxu0 }
 0x249   : > { %vm1948_vm6 = vcmp.gt.f32.partialorder %v3131_v41, %v1929_v46  ;;  %v1953_v47 = vrot.slane %v1929_v46, 2  ;;  %v1958_v48 = vrot.slane %v1929_v46, 4  ;;  %v1963_v49 = vrot.slane %v1929_v46, 6 }
 0x24a   : > { %v1966_v50 = vsel %vm1948_vm6, %v3131_v41, %v1929_v46 }
 0x24b   : > { %v1955_v51 = vsel %vm1948_vm6, %v1950_v44, %v1953_v47  ;;  %v1960_v52 = vsel %vm1948_vm6, %v1956_v45, %v1958_v48  ;;  %v1965_v53 = vsel %vm1948_vm6, %v1961_v19, %v1963_v49 }
 0x267   : > { %v3134_v54 = vpop.f32.mrb[18].mxu0 }
 0x268   : > { %v1939_v55 = vpop.f32.mrb[19].mxu0  ;;  %v1981_v59 = vrot.slane %v3134_v54, 2  ;;  %v1984_v60 = vrot.slane %v3134_v54, 4  ;;  %v1987_v61 = vrot.slane %v3134_v54, 6 }
 0x269   : > { %vm1967_vm8 = vcmp.gt.f32.partialorder %v1939_v55, %v1966_v50  ;;  %v1969_v56 = vrot.slane %v1939_v55, 2  ;;  %v1972_v57 = vrot.slane %v1939_v55, 4  ;;  %v1975_v58 = vrot.slane %v1939_v55, 6 }
 0x26a   : > { %v1978_v62 = vsel %vm1967_vm8, %v1939_v55, %v1966_v50 }
 0x26b   : > { %v1971_v32 = vsel %vm1967_vm8, %v1969_v56, %v1955_v51  ;;  %v1974_v63 = vsel %vm1967_vm8, %v1972_v57, %v1960_v52  ;;  %v1977_v2 = vsel %vm1967_vm8, %v1975_v58, %v1965_v53  ;;  %vm1979_vm15 = vcmp.gt.f32.partialorder %v3134_v54, %v1978_v62 }
 0x26c   : > { %v1986_v3 = vsel %vm1979_vm15, %v1984_v60, %v1974_v63  ;;  %v1989_v34 = vsel %vm1979_vm15, %v1987_v61, %v1977_v2  ;;  %v1990_v4 = vsel %vm1979_vm15, %v3134_v54, %v1978_v62  ;;  %v1983_v5 = vsel %vm1979_vm15, %v1981_v59, %v1971_v32 }
 0x26d   : > { %3424 = vrcp.f32 %v1990_v4  ;;  %vm1991_vm12 = vcmp.gt.f32.partialorder %v1990_v4, 0.0 }
 0x277   : > { %v3425_v6 = vpop.eup %3424 }
 0x278   : > { %v1994_v7 = vsel %vm1991_vm12, %v3425_v6, 0.0 }
 0x279   : > { %v2183_v8 = vmul.f32 %v1994_v7, %v1986_v3  ;;  %v2350_v9 = vmul.f32 %v1994_v7, %v1989_v34  ;;  %v2000_v0 = vmul.f32 %v1994_v7, %v1983_v5 }
 0x27b   : > { %3138 = vmatmul.mubr.msk.f32.vlgmr.msra.gmra.mrb[16].mxu1 %vm2001_vm13, %v2000_v0 }
 0x27c   : > { %3142 = vmatprep.mubr.msk.f32.mxu1 %vm2078_vm14, %v1995_v10 }
 0x34e   : > { %v2074_v11 = vpop.f32.mrb[16].mxu1 }
 0x34f   : > { %v3139_v13 = vpop.f32.mrb[17].mxu1  ;;  %3140 = vmatprep.subr.msk.mxu1 %vm1827_vm3, %v2074_v11 }
 0x350   : > { %3141 = vmatpush3.msk.msra.mxu1 %vm1827_vm3, %v2074_v11 }
 0x351   : > { %3143 = vmatmul.mubr.msk.f32.vlgmr.msra.gmra.mrb[18].mxu1 %vm2078_vm14, %v1996_v12  ;;  %3148 = vmatprep.subr.mxu1 %v3534_v1 }
 0x352   : > { %3145 = vmatprep.mubr.msk.f32.mxu1 %vm2078_vm14, %v1997_v22  ;;  %3149 = vmatpush3.msk.msra.mxu1 %vm1829_vm5, %v4308_v36 }
 0x355   : > { %3146 = vmatmul.mubr.msk.f32.gmra.mrb[20].mxu1 %vm2078_vm14, %v1998_v14 }
 0x356   : > { %3150 = vmatprep.mubr.msk.f32.mxu1 %vm3533_vm0, %v3534_v1 }
 0x359   : > { %3151 = vmatmul.mubr.msk.f32.vlgmr.msra.gmra.mrb[22].mxu1 %vm2001_vm13, %v2183_v8 }
 0x35a   : > { %3155 = vmatprep.mubr.msk.f32.mxu1 %vm2078_vm14, %v1995_v10 }
 0x424   : > { %v3144_v15 = vpop.f32.mrb[18].mxu1 }
 0x425   : > { %2180 = vst.msk [vmem:[%s4341_s26 + $0x8] sm:$0xff] %vm1850_vm9, %v3144_v15  ;;  %v2160_v16 = vpop.f32.mrb[19].mxu1 }
 0x426   : > { %2179 = vst.msk [vmem:[%s4341_s26] sm:$0xff] %vm1850_vm9, %v2160_v16 }
 0x428   : > { %v3147_v17 = vpop.f32.mrb[20].mxu1 }
 0x429   : > { %2182 = vst.msk [vmem:[%s4341_s26 + $0x18] sm:$0xff] %vm1850_vm9, %v3147_v17  ;;  %v2170_v18 = vpop.f32.mrb[21].mxu1 }
 0x42a   : > { %2181 = vst.msk [vmem:[%s4341_s26 + $0x10] sm:$0xff] %vm1850_vm9, %v2170_v18 }
 0x42c   : > { %v2253_v20 = vpop.f32.mrb[22].mxu1 }
 0x42d   : > { %v3152_v21 = vpop.f32.mrb[23].mxu1  ;;  %3153 = vmatprep.subr.msk.mxu1 %vm1827_vm3, %v2253_v20 }
 0x42e   : > { %3154 = vmatpush3.msk.msra.mxu1 %vm1827_vm3, %v2253_v20 }
 0x42f   : > { %3156 = vmatmul.mubr.msk.f32.vlgmr.msra.gmra.mrb[24].mxu1 %vm2078_vm14, %v1996_v12  ;;  %3161 = vmatprep.subr.mxu1 %v3534_v1 }
 0x430   : > { %3158 = vmatprep.mubr.msk.f32.mxu1 %vm2078_vm14, %v1997_v22  ;;  %3162 = vmatpush3.msk.msra.mxu1 %vm1829_vm5, %v4308_v36 }
 0x433   : > { %3159 = vmatmul.mubr.msk.f32.gmra.mrb[26].mxu1 %vm2078_vm14, %v1998_v14 }
 0x434   : > { %3163 = vmatprep.mubr.msk.f32.mxu1 %vm3533_vm0, %v3534_v1 }
 0x437   : > { %3164 = vmatmul.mubr.msk.f32.vlgmr.msra.gmra.mrb[28].mxu1 %vm2001_vm13, %v2350_v9 }
 0x502   : > { %v3157_v24 = vpop.f32.mrb[24].mxu1 }
 0x503   : > { %2802 = vst.msk [vmem:[%s4341_s26 + $0x28] sm:$0xff] %vm1850_vm9, %v3157_v24  ;;  %v2326_v26 = vpop.f32.mrb[25].mxu1 }
 0x504   : > { %2801 = vst.msk [vmem:[%s4341_s26 + $0x20] sm:$0xff] %vm1850_vm9, %v2326_v26 }
 0x506   : > { %v3160_v27 = vpop.f32.mrb[26].mxu1 }
 0x507   : > { %2804 = vst.msk [vmem:[%s4341_s26 + $0x38] sm:$0xff] %vm1850_vm9, %v3160_v27  ;;  %v2336_v28 = vpop.f32.mrb[27].mxu1 }
 0x508   : > { %2803 = vst.msk [vmem:[%s4341_s26 + $0x30] sm:$0xff] %vm1850_vm9, %v2336_v28 }
 0x50a   : > { %v2420_v1 = vpop.f32.mrb[28].mxu1 }
 0x50b   : > { %v3165_v29 = vpop.f32.mrb[29].mxu1  ;;  %3166 = vmatprep.subr.msk.mxu0 %vm1827_vm3, %v2420_v1 }
 0x50c   : > { %3167 = vmatpush3.msk.msra.mxu0 %vm1827_vm3, %v2420_v1 }
 0x50d   : > { %3169 = vmatmul.mubr.msk.f32.vlgmr.msra.gmra.mrb[20].mxu0 %vm2078_vm14, %v1996_v12 }
 0x50e   : > { %3171 = vmatprep.mubr.msk.f32.mxu0 %vm2078_vm14, %v1997_v22 }
 0x511   : > { %3172 = vmatmul.mubr.msk.f32.gmra.mrb[22].mxu0 %vm2078_vm14, %v1998_v14 }
 0x5e0   : > { %v3170_v23 = vpop.f32.mrb[20].mxu0 }
 0x5e1   : > { %2813 = vst.msk [vmem:[%s4341_s26 + $0x48] sm:$0xff] %vm1850_vm9, %v3170_v23  ;;  %v2493_v30 = vpop.f32.mrb[21].mxu0 }
 0x5e2   : > { %2812 = vst.msk [vmem:[%s4341_s26 + $0x40] sm:$0xff] %vm1850_vm9, %v2493_v30 }
 0x5e4   : > { %v3173_v25 = vpop.f32.mrb[22].mxu0 }
 0x5e5   : > { %2815 = vst.msk [vmem:[%s4341_s26 + $0x58] sm:$0xff] %vm1850_vm9, %v3173_v25  ;;  %v2503_v31 = vpop.f32.mrb[23].mxu0 }
 0x5e6   : > { %2814 = vst.msk [vmem:[%s4341_s26 + $0x50] sm:$0xff] %vm1850_vm9, %v2503_v31 }
 0x5e7   : > { %s4492_s30 = sld [smem:[#allocation20_spill]]  ;;  %s2823_s10 = sshll.u32 %s3614_s28, 9 }
 0x5e8   : > { %s2547_s14 = sshll.u32 %s4341_s26, 4  ;;  %s4493_s7 = sld [smem:[#allocation24_spill]]  ;;  %s2548_s14 = int_to_ptr.vmem [resolvable:$true] %s2547_s14 }
 0x5e9   : > { %s3536_s19 = smov 512   ;;  %s3537_s18 = smov 1024  }
 0x5ea   : > { %s3538_s9 = smov 4   ;;  %s3539_s8 = smov 128  }
 0x5eb   : > { %s3540_s28 = smov 8   ;;  %s3541_s0 = smov [#allocation10]  }
 0x5ec   : > { %s3542_s21 = smov 0  }
 0x5ed   : > { %p4494_p10 = scmp.ne.s32.totalorder %s4492_s30, 0 }
 0x5ee   : > { %s2530_s11 = scalar_lea.hbm %s4493_s7, %s2823_s10 }
 0x5ef   : > { %3335 = sst [smem:[#allocation11]] (%p4494_p10), %s3536_s19 }
 0x5f0   : > { %3336 = sst [smem:[#allocation11 + $0x1]] (%p4494_p10), %s3537_s18 }
 0x5f1   : > { %3337 = sst [smem:[#allocation11 + $0x2]] (%p4494_p10), %s3538_s9 }
 0x5f2   : > { %3338 = sst [smem:[#allocation11 + $0x3]] (%p4494_p10), %s3539_s8 }
 0x5f3   : > { %3339 = sst [smem:[#allocation11 + $0x4]] (%p4494_p10), %s3539_s8 }
 0x5f4   : > { %3340 = sst [smem:[#allocation11 + $0x5]] (%p4494_p10), %s3540_s28 }
 0x5f5   : > { %3341 = dma.general (%p4494_p10), %s2548_s14, 1536, %s2530_s11, %s2518_s6, %s3541_s0, [#allocation11], %s3542_s21, 0  }
 0x5f6 PF: > { %s4495_s13 = sld [smem:[#allocation16_spill]]  ;;  %s4496_s12 = sld [smem:[#allocation22_spill]] }
 0x5f7   : > { %p4498_p8 = scmp.ge.s32.totalorder %s3520_s27, 2 }
 0x5fc   : > { %s2575_s15 = sand.u32 1, %s4495_s13   ;;  %p4497_p1 = scmp.ne.s32.totalorder %s4496_s12, 0 }
 0x5fd   : > { %s2576_s29 = scalar_lea.sflag [#allocation4], %s2575_s15 }
 0x5fe   : > { %p3344_p7 = pnand %p4498_p8, %p4497_p1 }
 0x600   : > { %3491 = dma.done.wait (!%p3344_p7), %s2576_s29, 1536  }
 0x601   : > { %3493 = vsyncadd (!%p3344_p7), %s2576_s29, 4294965760  ;;  %s4499_s27 = sld [smem:[#allocation18_spill]]  ;;  %s4500_s16 = sld [smem:[#allocation21_spill]] }
 0x602   : > { %s4501_s26 = sld [smem:[#allocation17_spill]]  ;;  %s4502_s10 = sld [smem:[#allocation19_spill]] }
 0x603   : > { %s4503_s21 = smov %s3500_s22  ;;  %s4504_s22 = smov %s3504_s23 }
 0x604   : > { %s4506_s24 = smov %s3512_s25 }
 0x607   : > { %p22_p2 = scmp.ge.s32.totalorder %s4499_s27, 4   ;;  %s4505_s23 = smov %s4500_s16 }
 0x608   : > { %s4507_s25 = smov %s4501_s26  ;;  %s4508_s26 = smov %s4502_s10 }
 0x609   :  { %24 = sbr.rel (!%p22_p2) target bundleno = 12 (0xc), region = 118 }
 0x610   :  { %2581 = vsyncpa [#allocation3], 1 }
 0x611   :  { %2583 = vsyncpa [#allocation3 + $0x1], 1 }
 0x612   :  { %2584 = vsyncpa [#allocation6], 1 }
 0x613   :  { %2586 = vsyncpa [#allocation6 + $0x1], 1 }
 0x614   :  { %2587 = vsyncpa [#allocation4], 1 }
 0x615   :  { %2589 = vsyncpa [#allocation4 + $0x1], 1 }

</bundles_post_ra>
